<compile_context>
chip_gen: v5e
topology: v5e:2x2
jax: 0.10.0
libtpu: 0.0.40
codegen_flags: <defaults>
</compile_context>

<pallas_src>
import numpy as np
import jax
import jax.numpy as jnp
from jax.experimental import pallas as pl
from jax.experimental.pallas import tpu as pltpu


def _ikrl_convkb_kernel(
    x_ref,                               # (6*D, TB) feature-major conv rows
    w_fc_t_ref,                          # (D, OC)  fc weight, pre-transposed
    w_conv_ref, b_conv_ref, b_fc_ref,    # SMEM scalars: (OC*6,), (OC,), (1,)
    out_ref,                             # (1, TB)  lane-dense score row
):
    f32 = jnp.float32
    d, oc = w_fc_t_ref.shape
    tb = x_ref.shape[1]

    # 6 sequence rows, each (D, TB), full-lane tiles (TB on the lane axis).
    rows = tuple(x_ref[pl.ds(s * d, d), :].astype(f32) for s in range(6))
    w_fc_t = w_fc_t_ref[...].astype(f32)                          # (D, OC)

    # Per-channel accumulation: (1,6) conv == 6 scalar-splat MACs from SMEM,
    # then ReLU, then the fc multiply folded into a running (D, TB) partial.
    # TODO(synk): nn.Dropout is treated as eval-mode identity.
    score_part = jnp.zeros((d, tb), f32)
    for c in range(oc):
        acc = w_conv_ref[c * 6] * rows[0]
        for s in range(1, 6):
            acc = acc + w_conv_ref[c * 6 + s] * rows[s]
        act = jnp.maximum(acc + b_conv_ref[c], 0.0)               # ReLU
        score_part = score_part + act * w_fc_t[:, c:c + 1]        # (D, TB)

    # Single reduce over the D sublanes via an MXU matvec (no transpose):
    # directly yields the lane-dense (1, TB) output row.
    ones_row = jnp.ones((1, d), f32)
    out_row = jnp.dot(ones_row, score_part, preferred_element_type=f32)
    out_ref[...] = (out_row + b_fc_ref[0]).astype(out_ref.dtype)


def _pick_block_b(B):
    """Lane-aligned block (multiple of 128); prefer >=4 grid steps (v7x megacore)."""
    if B % 128 != 0:
        return B
    for min_steps in (4, 2):
        for cand in (512, 256, 128):
            if B % cand == 0 and B // cand >= min_steps:
                return cand
    return B


def ikrl_convkb_forward(batch_inputs, img, params, *, block_b=None):
    """IKRLConvKB.forward. Index gathers and the imgEmbed projection are
    plain-JAX glue; the ConvKB conv + ReLU + fc scoring is one fused kernel."""
    B = batch_inputs.shape[0]
    D = params["entity_embed"].shape[1]
    OC = params["w_conv"].shape[0]

    if block_b is None:
        block_b = _pick_block_b(B)
    assert B % block_b == 0, "batch must be divisible by block_b"
    assert block_b == B or block_b % 128 == 0, \
        "block_b must be a multiple of 128 (lane axis) or the full batch"
    n_blocks = B // block_b

    h, r, t = batch_inputs[:, 0], batch_inputs[:, 1], batch_inputs[:, 2]

    # imgEmbed projection outside the kernel (one well-shaped matmul).  When
    # the batch revisits entities (2B >= n_ent) project the whole table once
    # and gather D-wide projected rows; otherwise project the gathered rows.
    w_img, b_img = params["w_img"], params["b_img"]
    if 2 * B >= img.shape[0]:
        img_proj = img @ w_img + b_img                               # (n_ent, D)
        h_img = img_proj[h]
        t_img = img_proj[t]
    else:
        h_img = img[h] @ w_img + b_img
        t_img = img[t] @ w_img + b_img

    # TODO(synk): these row gathers stay in XLA; per-row in-kernel DMA gather
    # is descriptor-bound at D*4 = 128 B rows and not worth it.
    hs = params["entity_embed"][h]
    ts = params["entity_embed"][t]
    rs = params["relation_embed"][r]
    ri = params["relation_img_embed"][r]

    # Feature-major slab: row order matches torch.cat((head, relation, tail), 1)
    # with each pair = (structural, image).
    x_fm = jnp.concatenate([hs, h_img, rs, ri, ts, t_img], axis=1).T   # (6*D, B)
    x_fm = x_fm.astype(jnp.float32)

    # Tiny parameters: fc weight pre-transposed for column-broadcast use,
    # conv/bias params flattened to 1-D SMEM scalars (negligible padding).
    w_fc_t = params["w_fc"].T.astype(jnp.float32)                    # (D, OC)
    w_conv_flat = params["w_conv"].reshape(-1).astype(jnp.float32)   # (OC*6,)
    b_conv_flat = params["b_conv"].reshape(-1).astype(jnp.float32)   # (OC,)
    b_fc_flat = params["b_fc"].reshape(-1).astype(jnp.float32)       # (1,)

    smem_spec = pl.BlockSpec(memory_space=pltpu.MemorySpace.SMEM)

    out2d = pl.pallas_call(
        _ikrl_convkb_kernel,
        out_shape=jax.ShapeDtypeStruct((1, B), jnp.float32),
        grid=(n_blocks,),
        in_specs=[
            pl.BlockSpec((6 * D, block_b), lambda i: (0, i)),         # conv rows
            pl.BlockSpec((D, OC), lambda i: (0, 0)),                  # fc weight
            smem_spec, smem_spec, smem_spec,                          # conv W,b; fc b
        ],
        out_specs=pl.BlockSpec((1, block_b), lambda i: (0, i)),
        compiler_params=pltpu.CompilerParams(
            dimension_semantics=("parallel",)),
    )(x_fm, w_fc_t, w_conv_flat, b_conv_flat, b_fc_flat)

    return out2d.reshape(B, 1)


def reference_forward(batch_inputs, img, params):
    """Pure-JAX reference matching the PyTorch module exactly (eval mode)."""
    h, r, t = batch_inputs[:, 0], batch_inputs[:, 1], batch_inputs[:, 2]

    def img_embed(x):
        return x @ params["w_img"] + params["b_img"][0]

    head = jnp.stack([params["entity_embed"][h], img_embed(img[h])], axis=1)
    rel = jnp.stack([params["relation_embed"][r], params["relation_img_embed"][r]], axis=1)
    tail = jnp.stack([params["entity_embed"][t], img_embed(img[t])], axis=1)
    conv_in = jnp.concatenate([head, rel, tail], axis=1)                 # (B, 6, D)

    x = jnp.transpose(conv_in, (0, 2, 1))                                # (B, D, 6)
    conv = (jnp.einsum("bds,cs->bcd", x, params["w_conv"])
            + params["b_conv"][0][None, :, None])                        # (B, OC, D)
    act = jnp.maximum(conv, 0.0)
    flat = act.reshape(act.shape[0], -1)                                 # (B, OC*D), index c*D + d
    return flat @ params["w_fc"].reshape(1, -1).T + params["b_fc"]       # (B, 1)


if __name__ == "__main__":
    key = jax.random.PRNGKey(0)

    # Small synthetic config (consistent with the module's __init__):
    n_ent, n_rel = 128, 16
    dim, n_heads = 16, 2
    D = dim * n_heads        # dim * n_heads = 32
    F = 64                   # args.img.shape[1]
    OC = 8                   # args.out_channels
    B = 512                  # batch of (head, relation, tail) triples

    keys = jax.random.split(key, 10)
    params = {
        "entity_embed":       jax.random.normal(keys[0], (n_ent, D), jnp.float32),
        "relation_embed":     jax.random.normal(keys[1], (n_rel, D), jnp.float32),
        "relation_img_embed": jax.random.normal(keys[2], (n_rel, D), jnp.float32),
        # nn.Linear(F, D): weight stored pre-transposed as (F, D)
        "w_img":  jax.random.normal(keys[3], (F, D), jnp.float32) * 0.1,
        "b_img":  jax.random.normal(keys[4], (1, D), jnp.float32) * 0.1,
        # nn.Conv2d(1, OC, (1, 6)): weight (OC, 1, 1, 6) squeezed to (OC, 6)
        "w_conv": jax.random.normal(keys[5], (OC, 6), jnp.float32) * 0.1,
        "b_conv": jax.random.normal(keys[6], (1, OC), jnp.float32) * 0.1,
        # nn.Linear(OC*D, 1): weight (1, OC*D) reshaped to (OC, D)
        "w_fc":   jax.random.normal(keys[7], (OC, D), jnp.float32) * 0.1,
        "b_fc":   jax.random.normal(keys[8], (1, 1), jnp.float32) * 0.1,
    }
    img = jax.random.normal(keys[9], (n_ent, F), jnp.float32)

    bk = jax.random.split(jax.random.PRNGKey(1), 2)
    ht = jax.random.randint(bk[0], (B, 2), 0, n_ent, jnp.int32)
    rr = jax.random.randint(bk[1], (B, 1), 0, n_rel, jnp.int32)
    batch_inputs = jnp.concatenate([ht[:, :1], rr, ht[:, 1:]], axis=1)   # (B, 3)

    out = jax.block_until_ready(ikrl_convkb_forward(batch_inputs, img, params))
    ref = reference_forward(batch_inputs, img, params)
    assert out.shape == (B, 1)
    np.testing.assert_allclose(np.asarray(out), np.asarray(ref), rtol=1e-4, atol=1e-4)
    print("KERNEL_OK")
</pallas_src>

<mosaic_0001>
module attributes {stable_mosaic.version = 11 : i64} {
  func.func @_ikrl_convkb_kernel(%arg0: i32, %arg1: memref<192x128xf32, #tpu.memory_space<vmem>>, %arg2: memref<32x8xf32, #tpu.memory_space<vmem>>, %arg3: memref<48xf32, #tpu.memory_space<smem>>, %arg4: memref<8xf32, #tpu.memory_space<smem>>, %arg5: memref<1xf32, #tpu.memory_space<smem>>, %arg6: memref<1x128xf32, #tpu.memory_space<vmem>>) attributes {dimension_semantics = [#tpu.dimension_semantics<parallel>], iteration_bounds = array<i64: 4>, scalar_prefetch = 0 : i64, scratch_operands = 0 : i64, tpu.core_type = #tpu.core_type<tc>, window_params = [{transform_indices = @transform_0, window_bounds = array<i64: 192, 128>}, {pipeline_mode = #tpu.pipeline_mode<synchronous>, transform_indices = @transform_1, window_bounds = array<i64: 32, 8>}, {transform_indices = @transform_2, window_bounds = array<i64: 48>}, {transform_indices = @transform_3, window_bounds = array<i64: 8>}, {transform_indices = @transform_4, window_bounds = array<i64: 1>}, {transform_indices = @transform_5, window_bounds = array<i64: 1, 128>}]} {
    %c0 = arith.constant 0 : index
    %c0_0 = arith.constant 0 : index
    %0 = vector.load %arg1[%c0, %c0_0] : memref<192x128xf32, #tpu.memory_space<vmem>>, vector<32x128xf32>
    %c32 = arith.constant 32 : index
    %c0_1 = arith.constant 0 : index
    %1 = vector.load %arg1[%c32, %c0_1] : memref<192x128xf32, #tpu.memory_space<vmem>>, vector<32x128xf32>
    %c64 = arith.constant 64 : index
    %c0_2 = arith.constant 0 : index
    %2 = vector.load %arg1[%c64, %c0_2] : memref<192x128xf32, #tpu.memory_space<vmem>>, vector<32x128xf32>
    %c96 = arith.constant 96 : index
    %c0_3 = arith.constant 0 : index
    %3 = vector.load %arg1[%c96, %c0_3] : memref<192x128xf32, #tpu.memory_space<vmem>>, vector<32x128xf32>
    %c128 = arith.constant 128 : index
    %c0_4 = arith.constant 0 : index
    %4 = vector.load %arg1[%c128, %c0_4] : memref<192x128xf32, #tpu.memory_space<vmem>>, vector<32x128xf32>
    %c160 = arith.constant 160 : index
    %c0_5 = arith.constant 0 : index
    %5 = vector.load %arg1[%c160, %c0_5] : memref<192x128xf32, #tpu.memory_space<vmem>>, vector<32x128xf32>
    %c0_6 = arith.constant 0 : index
    %c0_7 = arith.constant 0 : index
    %6 = vector.load %arg2[%c0_6, %c0_7] : memref<32x8xf32, #tpu.memory_space<vmem>>, vector<32x8xf32>
    %cst = arith.constant 0.000000e+00 : f32
    %7 = vector.broadcast %cst : f32 to vector<32x128xf32>
    %c0_8 = arith.constant 0 : index
    %8 = memref.load %arg3[%c0_8] : memref<48xf32, #tpu.memory_space<smem>>
    %9 = vector.broadcast %8 : f32 to vector<32x128xf32>
    %10 = arith.mulf %9, %0 : vector<32x128xf32>
    %c1 = arith.constant 1 : index
    %11 = memref.load %arg3[%c1] : memref<48xf32, #tpu.memory_space<smem>>
    %12 = vector.broadcast %11 : f32 to vector<32x128xf32>
    %13 = arith.mulf %12, %1 : vector<32x128xf32>
    %14 = arith.addf %10, %13 : vector<32x128xf32>
    %c2 = arith.constant 2 : index
    %15 = memref.load %arg3[%c2] : memref<48xf32, #tpu.memory_space<smem>>
    %16 = vector.broadcast %15 : f32 to vector<32x128xf32>
    %17 = arith.mulf %16, %2 : vector<32x128xf32>
    %18 = arith.addf %14, %17 : vector<32x128xf32>
    %c3 = arith.constant 3 : index
    %19 = memref.load %arg3[%c3] : memref<48xf32, #tpu.memory_space<smem>>
    %20 = vector.broadcast %19 : f32 to vector<32x128xf32>
    %21 = arith.mulf %20, %3 : vector<32x128xf32>
    %22 = arith.addf %18, %21 : vector<32x128xf32>
    %c4 = arith.constant 4 : index
    %23 = memref.load %arg3[%c4] : memref<48xf32, #tpu.memory_space<smem>>
    %24 = vector.broadcast %23 : f32 to vector<32x128xf32>
    %25 = arith.mulf %24, %4 : vector<32x128xf32>
    %26 = arith.addf %22, %25 : vector<32x128xf32>
    %c5 = arith.constant 5 : index
    %27 = memref.load %arg3[%c5] : memref<48xf32, #tpu.memory_space<smem>>
    %28 = vector.broadcast %27 : f32 to vector<32x128xf32>
    %29 = arith.mulf %28, %5 : vector<32x128xf32>
    %30 = arith.addf %26, %29 : vector<32x128xf32>
    %c0_9 = arith.constant 0 : index
    %31 = memref.load %arg4[%c0_9] : memref<8xf32, #tpu.memory_space<smem>>
    %32 = vector.broadcast %31 : f32 to vector<32x128xf32>
    %33 = arith.addf %30, %32 : vector<32x128xf32>
    %cst_10 = arith.constant 0.000000e+00 : f32
    %34 = vector.broadcast %cst_10 : f32 to vector<32x128xf32>
    %35 = arith.maximumf %33, %34 : vector<32x128xf32>
    %36 = vector.extract_strided_slice %6 {offsets = [0, 0], sizes = [32, 1], strides = [1, 1]} : vector<32x8xf32> to vector<32x1xf32>
    %37 = vector.broadcast %36 : vector<32x1xf32> to vector<32x128xf32>
    %38 = arith.mulf %35, %37 : vector<32x128xf32>
    %39 = arith.addf %7, %38 : vector<32x128xf32>
    %c6 = arith.constant 6 : index
    %40 = memref.load %arg3[%c6] : memref<48xf32, #tpu.memory_space<smem>>
    %41 = vector.broadcast %40 : f32 to vector<32x128xf32>
    %42 = arith.mulf %41, %0 : vector<32x128xf32>
    %c7 = arith.constant 7 : index
    %43 = memref.load %arg3[%c7] : memref<48xf32, #tpu.memory_space<smem>>
    %44 = vector.broadcast %43 : f32 to vector<32x128xf32>
    %45 = arith.mulf %44, %1 : vector<32x128xf32>
    %46 = arith.addf %42, %45 : vector<32x128xf32>
    %c8 = arith.constant 8 : index
    %47 = memref.load %arg3[%c8] : memref<48xf32, #tpu.memory_space<smem>>
    %48 = vector.broadcast %47 : f32 to vector<32x128xf32>
    %49 = arith.mulf %48, %2 : vector<32x128xf32>
    %50 = arith.addf %46, %49 : vector<32x128xf32>
    %c9 = arith.constant 9 : index
    %51 = memref.load %arg3[%c9] : memref<48xf32, #tpu.memory_space<smem>>
    %52 = vector.broadcast %51 : f32 to vector<32x128xf32>
    %53 = arith.mulf %52, %3 : vector<32x128xf32>
    %54 = arith.addf %50, %53 : vector<32x128xf32>
    %c10 = arith.constant 10 : index
    %55 = memref.load %arg3[%c10] : memref<48xf32, #tpu.memory_space<smem>>
    %56 = vector.broadcast %55 : f32 to vector<32x128xf32>
    %57 = arith.mulf %56, %4 : vector<32x128xf32>
    %58 = arith.addf %54, %57 : vector<32x128xf32>
    %c11 = arith.constant 11 : index
    %59 = memref.load %arg3[%c11] : memref<48xf32, #tpu.memory_space<smem>>
    %60 = vector.broadcast %59 : f32 to vector<32x128xf32>
    %61 = arith.mulf %60, %5 : vector<32x128xf32>
    %62 = arith.addf %58, %61 : vector<32x128xf32>
    %c1_11 = arith.constant 1 : index
    %63 = memref.load %arg4[%c1_11] : memref<8xf32, #tpu.memory_space<smem>>
    %64 = vector.broadcast %63 : f32 to vector<32x128xf32>
    %65 = arith.addf %62, %64 : vector<32x128xf32>
    %cst_12 = arith.constant 0.000000e+00 : f32
    %66 = vector.broadcast %cst_12 : f32 to vector<32x128xf32>
    %67 = arith.maximumf %65, %66 : vector<32x128xf32>
    %68 = vector.extract_strided_slice %6 {offsets = [0, 1], sizes = [32, 1], strides = [1, 1]} : vector<32x8xf32> to vector<32x1xf32>
    %69 = vector.broadcast %68 : vector<32x1xf32> to vector<32x128xf32>
    %70 = arith.mulf %67, %69 : vector<32x128xf32>
    %71 = arith.addf %39, %70 : vector<32x128xf32>
    %c12 = arith.constant 12 : index
    %72 = memref.load %arg3[%c12] : memref<48xf32, #tpu.memory_space<smem>>
    %73 = vector.broadcast %72 : f32 to vector<32x128xf32>
    %74 = arith.mulf %73, %0 : vector<32x128xf32>
    %c13 = arith.constant 13 : index
    %75 = memref.load %arg3[%c13] : memref<48xf32, #tpu.memory_space<smem>>
    %76 = vector.broadcast %75 : f32 to vector<32x128xf32>
    %77 = arith.mulf %76, %1 : vector<32x128xf32>
    %78 = arith.addf %74, %77 : vector<32x128xf32>
    %c14 = arith.constant 14 : index
    %79 = memref.load %arg3[%c14] : memref<48xf32, #tpu.memory_space<smem>>
    %80 = vector.broadcast %79 : f32 to vector<32x128xf32>
    %81 = arith.mulf %80, %2 : vector<32x128xf32>
    %82 = arith.addf %78, %81 : vector<32x128xf32>
    %c15 = arith.constant 15 : index
    %83 = memref.load %arg3[%c15] : memref<48xf32, #tpu.memory_space<smem>>
    %84 = vector.broadcast %83 : f32 to vector<32x128xf32>
    %85 = arith.mulf %84, %3 : vector<32x128xf32>
    %86 = arith.addf %82, %85 : vector<32x128xf32>
    %c16 = arith.constant 16 : index
    %87 = memref.load %arg3[%c16] : memref<48xf32, #tpu.memory_space<smem>>
    %88 = vector.broadcast %87 : f32 to vector<32x128xf32>
    %89 = arith.mulf %88, %4 : vector<32x128xf32>
    %90 = arith.addf %86, %89 : vector<32x128xf32>
    %c17 = arith.constant 17 : index
    %91 = memref.load %arg3[%c17] : memref<48xf32, #tpu.memory_space<smem>>
    %92 = vector.broadcast %91 : f32 to vector<32x128xf32>
    %93 = arith.mulf %92, %5 : vector<32x128xf32>
    %94 = arith.addf %90, %93 : vector<32x128xf32>
    %c2_13 = arith.constant 2 : index
    %95 = memref.load %arg4[%c2_13] : memref<8xf32, #tpu.memory_space<smem>>
    %96 = vector.broadcast %95 : f32 to vector<32x128xf32>
    %97 = arith.addf %94, %96 : vector<32x128xf32>
    %cst_14 = arith.constant 0.000000e+00 : f32
    %98 = vector.broadcast %cst_14 : f32 to vector<32x128xf32>
    %99 = arith.maximumf %97, %98 : vector<32x128xf32>
    %100 = vector.extract_strided_slice %6 {offsets = [0, 2], sizes = [32, 1], strides = [1, 1]} : vector<32x8xf32> to vector<32x1xf32>
    %101 = vector.broadcast %100 : vector<32x1xf32> to vector<32x128xf32>
    %102 = arith.mulf %99, %101 : vector<32x128xf32>
    %103 = arith.addf %71, %102 : vector<32x128xf32>
    %c18 = arith.constant 18 : index
    %104 = memref.load %arg3[%c18] : memref<48xf32, #tpu.memory_space<smem>>
    %105 = vector.broadcast %104 : f32 to vector<32x128xf32>
    %106 = arith.mulf %105, %0 : vector<32x128xf32>
    %c19 = arith.constant 19 : index
    %107 = memref.load %arg3[%c19] : memref<48xf32, #tpu.memory_space<smem>>
    %108 = vector.broadcast %107 : f32 to vector<32x128xf32>
    %109 = arith.mulf %108, %1 : vector<32x128xf32>
    %110 = arith.addf %106, %109 : vector<32x128xf32>
    %c20 = arith.constant 20 : index
    %111 = memref.load %arg3[%c20] : memref<48xf32, #tpu.memory_space<smem>>
    %112 = vector.broadcast %111 : f32 to vector<32x128xf32>
    %113 = arith.mulf %112, %2 : vector<32x128xf32>
    %114 = arith.addf %110, %113 : vector<32x128xf32>
    %c21 = arith.constant 21 : index
    %115 = memref.load %arg3[%c21] : memref<48xf32, #tpu.memory_space<smem>>
    %116 = vector.broadcast %115 : f32 to vector<32x128xf32>
    %117 = arith.mulf %116, %3 : vector<32x128xf32>
    %118 = arith.addf %114, %117 : vector<32x128xf32>
    %c22 = arith.constant 22 : index
    %119 = memref.load %arg3[%c22] : memref<48xf32, #tpu.memory_space<smem>>
    %120 = vector.broadcast %119 : f32 to vector<32x128xf32>
    %121 = arith.mulf %120, %4 : vector<32x128xf32>
    %122 = arith.addf %118, %121 : vector<32x128xf32>
    %c23 = arith.constant 23 : index
    %123 = memref.load %arg3[%c23] : memref<48xf32, #tpu.memory_space<smem>>
    %124 = vector.broadcast %123 : f32 to vector<32x128xf32>
    %125 = arith.mulf %124, %5 : vector<32x128xf32>
    %126 = arith.addf %122, %125 : vector<32x128xf32>
    %c3_15 = arith.constant 3 : index
    %127 = memref.load %arg4[%c3_15] : memref<8xf32, #tpu.memory_space<smem>>
    %128 = vector.broadcast %127 : f32 to vector<32x128xf32>
    %129 = arith.addf %126, %128 : vector<32x128xf32>
    %cst_16 = arith.constant 0.000000e+00 : f32
    %130 = vector.broadcast %cst_16 : f32 to vector<32x128xf32>
    %131 = arith.maximumf %129, %130 : vector<32x128xf32>
    %132 = vector.extract_strided_slice %6 {offsets = [0, 3], sizes = [32, 1], strides = [1, 1]} : vector<32x8xf32> to vector<32x1xf32>
    %133 = vector.broadcast %132 : vector<32x1xf32> to vector<32x128xf32>
    %134 = arith.mulf %131, %133 : vector<32x128xf32>
    %135 = arith.addf %103, %134 : vector<32x128xf32>
    %c24 = arith.constant 24 : index
    %136 = memref.load %arg3[%c24] : memref<48xf32, #tpu.memory_space<smem>>
    %137 = vector.broadcast %136 : f32 to vector<32x128xf32>
    %138 = arith.mulf %137, %0 : vector<32x128xf32>
    %c25 = arith.constant 25 : index
    %139 = memref.load %arg3[%c25] : memref<48xf32, #tpu.memory_space<smem>>
    %140 = vector.broadcast %139 : f32 to vector<32x128xf32>
    %141 = arith.mulf %140, %1 : vector<32x128xf32>
    %142 = arith.addf %138, %141 : vector<32x128xf32>
    %c26 = arith.constant 26 : index
    %143 = memref.load %arg3[%c26] : memref<48xf32, #tpu.memory_space<smem>>
    %144 = vector.broadcast %143 : f32 to vector<32x128xf32>
    %145 = arith.mulf %144, %2 : vector<32x128xf32>
    %146 = arith.addf %142, %145 : vector<32x128xf32>
    %c27 = arith.constant 27 : index
    %147 = memref.load %arg3[%c27] : memref<48xf32, #tpu.memory_space<smem>>
    %148 = vector.broadcast %147 : f32 to vector<32x128xf32>
    %149 = arith.mulf %148, %3 : vector<32x128xf32>
    %150 = arith.addf %146, %149 : vector<32x128xf32>
    %c28 = arith.constant 28 : index
    %151 = memref.load %arg3[%c28] : memref<48xf32, #tpu.memory_space<smem>>
    %152 = vector.broadcast %151 : f32 to vector<32x128xf32>
    %153 = arith.mulf %152, %4 : vector<32x128xf32>
    %154 = arith.addf %150, %153 : vector<32x128xf32>
    %c29 = arith.constant 29 : index
    %155 = memref.load %arg3[%c29] : memref<48xf32, #tpu.memory_space<smem>>
    %156 = vector.broadcast %155 : f32 to vector<32x128xf32>
    %157 = arith.mulf %156, %5 : vector<32x128xf32>
    %158 = arith.addf %154, %157 : vector<32x128xf32>
    %c4_17 = arith.constant 4 : index
    %159 = memref.load %arg4[%c4_17] : memref<8xf32, #tpu.memory_space<smem>>
    %160 = vector.broadcast %159 : f32 to vector<32x128xf32>
    %161 = arith.addf %158, %160 : vector<32x128xf32>
    %cst_18 = arith.constant 0.000000e+00 : f32
    %162 = vector.broadcast %cst_18 : f32 to vector<32x128xf32>
    %163 = arith.maximumf %161, %162 : vector<32x128xf32>
    %164 = vector.extract_strided_slice %6 {offsets = [0, 4], sizes = [32, 1], strides = [1, 1]} : vector<32x8xf32> to vector<32x1xf32>
    %165 = vector.broadcast %164 : vector<32x1xf32> to vector<32x128xf32>
    %166 = arith.mulf %163, %165 : vector<32x128xf32>
    %167 = arith.addf %135, %166 : vector<32x128xf32>
    %c30 = arith.constant 30 : index
    %168 = memref.load %arg3[%c30] : memref<48xf32, #tpu.memory_space<smem>>
    %169 = vector.broadcast %168 : f32 to vector<32x128xf32>
    %170 = arith.mulf %169, %0 : vector<32x128xf32>
    %c31 = arith.constant 31 : index
    %171 = memref.load %arg3[%c31] : memref<48xf32, #tpu.memory_space<smem>>
    %172 = vector.broadcast %171 : f32 to vector<32x128xf32>
    %173 = arith.mulf %172, %1 : vector<32x128xf32>
    %174 = arith.addf %170, %173 : vector<32x128xf32>
    %c32_19 = arith.constant 32 : index
    %175 = memref.load %arg3[%c32_19] : memref<48xf32, #tpu.memory_space<smem>>
    %176 = vector.broadcast %175 : f32 to vector<32x128xf32>
    %177 = arith.mulf %176, %2 : vector<32x128xf32>
    %178 = arith.addf %174, %177 : vector<32x128xf32>
    %c33 = arith.constant 33 : index
    %179 = memref.load %arg3[%c33] : memref<48xf32, #tpu.memory_space<smem>>
    %180 = vector.broadcast %179 : f32 to vector<32x128xf32>
    %181 = arith.mulf %180, %3 : vector<32x128xf32>
    %182 = arith.addf %178, %181 : vector<32x128xf32>
    %c34 = arith.constant 34 : index
    %183 = memref.load %arg3[%c34] : memref<48xf32, #tpu.memory_space<smem>>
    %184 = vector.broadcast %183 : f32 to vector<32x128xf32>
    %185 = arith.mulf %184, %4 : vector<32x128xf32>
    %186 = arith.addf %182, %185 : vector<32x128xf32>
    %c35 = arith.constant 35 : index
    %187 = memref.load %arg3[%c35] : memref<48xf32, #tpu.memory_space<smem>>
    %188 = vector.broadcast %187 : f32 to vector<32x128xf32>
    %189 = arith.mulf %188, %5 : vector<32x128xf32>
    %190 = arith.addf %186, %189 : vector<32x128xf32>
    %c5_20 = arith.constant 5 : index
    %191 = memref.load %arg4[%c5_20] : memref<8xf32, #tpu.memory_space<smem>>
    %192 = vector.broadcast %191 : f32 to vector<32x128xf32>
    %193 = arith.addf %190, %192 : vector<32x128xf32>
    %cst_21 = arith.constant 0.000000e+00 : f32
    %194 = vector.broadcast %cst_21 : f32 to vector<32x128xf32>
    %195 = arith.maximumf %193, %194 : vector<32x128xf32>
    %196 = vector.extract_strided_slice %6 {offsets = [0, 5], sizes = [32, 1], strides = [1, 1]} : vector<32x8xf32> to vector<32x1xf32>
    %197 = vector.broadcast %196 : vector<32x1xf32> to vector<32x128xf32>
    %198 = arith.mulf %195, %197 : vector<32x128xf32>
    %199 = arith.addf %167, %198 : vector<32x128xf32>
    %c36 = arith.constant 36 : index
    %200 = memref.load %arg3[%c36] : memref<48xf32, #tpu.memory_space<smem>>
    %201 = vector.broadcast %200 : f32 to vector<32x128xf32>
    %202 = arith.mulf %201, %0 : vector<32x128xf32>
    %c37 = arith.constant 37 : index
    %203 = memref.load %arg3[%c37] : memref<48xf32, #tpu.memory_space<smem>>
    %204 = vector.broadcast %203 : f32 to vector<32x128xf32>
    %205 = arith.mulf %204, %1 : vector<32x128xf32>
    %206 = arith.addf %202, %205 : vector<32x128xf32>
    %c38 = arith.constant 38 : index
    %207 = memref.load %arg3[%c38] : memref<48xf32, #tpu.memory_space<smem>>
    %208 = vector.broadcast %207 : f32 to vector<32x128xf32>
    %209 = arith.mulf %208, %2 : vector<32x128xf32>
    %210 = arith.addf %206, %209 : vector<32x128xf32>
    %c39 = arith.constant 39 : index
    %211 = memref.load %arg3[%c39] : memref<48xf32, #tpu.memory_space<smem>>
    %212 = vector.broadcast %211 : f32 to vector<32x128xf32>
    %213 = arith.mulf %212, %3 : vector<32x128xf32>
    %214 = arith.addf %210, %213 : vector<32x128xf32>
    %c40 = arith.constant 40 : index
    %215 = memref.load %arg3[%c40] : memref<48xf32, #tpu.memory_space<smem>>
    %216 = vector.broadcast %215 : f32 to vector<32x128xf32>
    %217 = arith.mulf %216, %4 : vector<32x128xf32>
    %218 = arith.addf %214, %217 : vector<32x128xf32>
    %c41 = arith.constant 41 : index
    %219 = memref.load %arg3[%c41] : memref<48xf32, #tpu.memory_space<smem>>
    %220 = vector.broadcast %219 : f32 to vector<32x128xf32>
    %221 = arith.mulf %220, %5 : vector<32x128xf32>
    %222 = arith.addf %218, %221 : vector<32x128xf32>
    %c6_22 = arith.constant 6 : index
    %223 = memref.load %arg4[%c6_22] : memref<8xf32, #tpu.memory_space<smem>>
    %224 = vector.broadcast %223 : f32 to vector<32x128xf32>
    %225 = arith.addf %222, %224 : vector<32x128xf32>
    %cst_23 = arith.constant 0.000000e+00 : f32
    %226 = vector.broadcast %cst_23 : f32 to vector<32x128xf32>
    %227 = arith.maximumf %225, %226 : vector<32x128xf32>
    %228 = vector.extract_strided_slice %6 {offsets = [0, 6], sizes = [32, 1], strides = [1, 1]} : vector<32x8xf32> to vector<32x1xf32>
    %229 = vector.broadcast %228 : vector<32x1xf32> to vector<32x128xf32>
    %230 = arith.mulf %227, %229 : vector<32x128xf32>
    %231 = arith.addf %199, %230 : vector<32x128xf32>
    %c42 = arith.constant 42 : index
    %232 = memref.load %arg3[%c42] : memref<48xf32, #tpu.memory_space<smem>>
    %233 = vector.broadcast %232 : f32 to vector<32x128xf32>
    %234 = arith.mulf %233, %0 : vector<32x128xf32>
    %c43 = arith.constant 43 : index
    %235 = memref.load %arg3[%c43] : memref<48xf32, #tpu.memory_space<smem>>
    %236 = vector.broadcast %235 : f32 to vector<32x128xf32>
    %237 = arith.mulf %236, %1 : vector<32x128xf32>
    %238 = arith.addf %234, %237 : vector<32x128xf32>
    %c44 = arith.constant 44 : index
    %239 = memref.load %arg3[%c44] : memref<48xf32, #tpu.memory_space<smem>>
    %240 = vector.broadcast %239 : f32 to vector<32x128xf32>
    %241 = arith.mulf %240, %2 : vector<32x128xf32>
    %242 = arith.addf %238, %241 : vector<32x128xf32>
    %c45 = arith.constant 45 : index
    %243 = memref.load %arg3[%c45] : memref<48xf32, #tpu.memory_space<smem>>
    %244 = vector.broadcast %243 : f32 to vector<32x128xf32>
    %245 = arith.mulf %244, %3 : vector<32x128xf32>
    %246 = arith.addf %242, %245 : vector<32x128xf32>
    %c46 = arith.constant 46 : index
    %247 = memref.load %arg3[%c46] : memref<48xf32, #tpu.memory_space<smem>>
    %248 = vector.broadcast %247 : f32 to vector<32x128xf32>
    %249 = arith.mulf %248, %4 : vector<32x128xf32>
    %250 = arith.addf %246, %249 : vector<32x128xf32>
    %c47 = arith.constant 47 : index
    %251 = memref.load %arg3[%c47] : memref<48xf32, #tpu.memory_space<smem>>
    %252 = vector.broadcast %251 : f32 to vector<32x128xf32>
    %253 = arith.mulf %252, %5 : vector<32x128xf32>
    %254 = arith.addf %250, %253 : vector<32x128xf32>
    %c7_24 = arith.constant 7 : index
    %255 = memref.load %arg4[%c7_24] : memref<8xf32, #tpu.memory_space<smem>>
    %256 = vector.broadcast %255 : f32 to vector<32x128xf32>
    %257 = arith.addf %254, %256 : vector<32x128xf32>
    %cst_25 = arith.constant 0.000000e+00 : f32
    %258 = vector.broadcast %cst_25 : f32 to vector<32x128xf32>
    %259 = arith.maximumf %257, %258 : vector<32x128xf32>
    %260 = vector.extract_strided_slice %6 {offsets = [0, 7], sizes = [32, 1], strides = [1, 1]} : vector<32x8xf32> to vector<32x1xf32>
    %261 = vector.broadcast %260 : vector<32x1xf32> to vector<32x128xf32>
    %262 = arith.mulf %259, %261 : vector<32x128xf32>
    %263 = arith.addf %231, %262 : vector<32x128xf32>
    %cst_26 = arith.constant 1.000000e+00 : f32
    %264 = vector.broadcast %cst_26 : f32 to vector<1x32xf32>
    %cst_27 = arith.constant dense<0.000000e+00> : vector<1x128xf32>
    %265 = tpu.matmul %264, %263, %cst_27 {dimension_numbers = #tpu.dot_dimension_numbers<[1], [0], [0], [1], [0, 0, 1, 1], [], []>} : vector<1x32xf32>, vector<32x128xf32>, vector<1x128xf32> -> vector<1x128xf32>
    %c0_28 = arith.constant 0 : index
    %266 = memref.load %arg5[%c0_28] : memref<1xf32, #tpu.memory_space<smem>>
    %267 = vector.broadcast %266 : f32 to vector<1x128xf32>
    %268 = arith.addf %265, %267 : vector<1x128xf32>
    %c0_29 = arith.constant 0 : index
    %c0_30 = arith.constant 0 : index
    %269 = vector.load %arg6[%c0_29, %c0_30] : memref<1x128xf32, #tpu.memory_space<vmem>>, vector<1x128xf32>
    tpu.vector_store %arg6[%c0_29, %c0_30], %268 {strides = array<i32>} : memref<1x128xf32, #tpu.memory_space<vmem>>, vector<1x128xf32>,
    return
  }
  func.func @transform_0(%arg0: i32) -> (i32, i32) {
    %c0_i32 = arith.constant 0 : i32
    %c0_i32_0 = arith.constant 0 : i32
    return %c0_i32, %arg0 : i32, i32
  }
  func.func @transform_1(%arg0: i32) -> (i32, i32) {
    %c0_i32 = arith.constant 0 : i32
    %c0_i32_0 = arith.constant 0 : i32
    %c0_i32_1 = arith.constant 0 : i32
    return %c0_i32, %c0_i32_0 : i32, i32
  }
  func.func @transform_2(%arg0: i32) -> i32 {
    %c0_i32 = arith.constant 0 : i32
    %c0_i32_0 = arith.constant 0 : i32
    return %c0_i32 : i32
  }
  func.func @transform_3(%arg0: i32) -> i32 {
    %c0_i32 = arith.constant 0 : i32
    %c0_i32_0 = arith.constant 0 : i32
    return %c0_i32 : i32
  }
  func.func @transform_4(%arg0: i32) -> i32 {
    %c0_i32 = arith.constant 0 : i32
    %c0_i32_0 = arith.constant 0 : i32
    return %c0_i32 : i32
  }
  func.func @transform_5(%arg0: i32) -> (i32, i32) {
    %c0_i32 = arith.constant 0 : i32
    %c0_i32_0 = arith.constant 0 : i32
    return %c0_i32, %arg0 : i32, i32
  }
}

</mosaic_0001>

<bundles_post_ra>
// kernel: tpu_custom_call.1
= control target key start
LH: loop header
LB: loop body
LE: loop exit
PB: predicated region body
PF: predicated region fallthrough
CT: control target
= control target key end

     0   :  { %s2593_s0 = inlined_call_operand.hbm [shape: f32[192,512], index: 0, kind: input, shape index: {}]   ;;  %s2594_s1 = inlined_call_operand.vmem [shape: f32[32,8], index: 1, kind: input, shape index: {}]   ;;  %s2595_s2 = inlined_call_operand.vmem [shape: f32[48], index: 2, kind: input, shape index: {}]   ;;  %s2596_s3 = inlined_call_operand.vmem [shape: f32[8], index: 3, kind: input, shape index: {}]   ;;  %s2597_s4 = inlined_call_operand.<no memory space> [shape: f32[1], index: 4, kind: input, shape index: {}]   ;;  %s2598_s5 = inlined_call_operand.hbm [shape: f32[1,512], index: 5, kind: output, shape index: {}]  }
   0x1   :  { %2685 = sst [smem:[#allocation63_spill]] %s2595_s2 }
   0x2   :  { %2686 = sst [smem:[#allocation64_spill]] %s2596_s3 }
   0x3   :  { %10 = sst [smem:[#allocation2]] %s2597_s4 }
   0x4   :  { %11 = vsyncpa [#allocation4], 0 }
   0x5   :  { %13 = vsyncpa [#allocation4 + $0x1], 0 }
   0x6   :  { %14 = vsyncpa [#allocation6], 0 }
   0x7   :  { %15 = vsyncpa [#allocation9], 0 }
   0x8   :  { %16 = vsyncpa [#allocation5], 0 }
   0x9   :  { %18 = vsyncpa [#allocation5 + $0x1], 0  ;;  %s1506_s20 = smov 0   ;;  %s1508_s21 = smov 0  }
   0xa   :  { %s1510_s22 = smov 0   ;;  %s1512_s23 = smov 0  }
   0xb LB: > { %s1527_s4 = sadd.s32 4294967295, %s1457_s23   ;;  %s1151_s24 = sadd.s32 4294967294, %s1457_s23   ;;  %s1457_s23 = sphi %s1512_s23, %s2826_s23   ;;  %s1453_s22 = sphi %s1510_s22, %s2825_s22   ;;  %s1449_s21 = sphi %s1508_s21, %s2824_s21   ;;  %s1445_s20 = sphi %s1506_s20, %s2823_s20  }
   0xc   : > { %s1531_s25 = sadd.s32 1, %s1457_s23   ;;  %s31_s26 = sadd.s32 1, %s1453_s22 }
   0xd   : > { %s28_s27 = ssub.s32 %s1457_s23, %s1531_s25  ;;  %p38_p0 = scmp.ne.s32.totalorder %s1453_s22, %s1449_s21 }
   0xe   : > { %p29_p1 = scmp.eq.s32.totalorder %s28_s27, 0  ;;  %p39_p2 = scmp.eq.s32.totalorder %s1457_s23, 0 }
   0xf   : > { %p44_p3 = scmp.ne.s32.totalorder %s1449_s21, %s1445_s20  ;;  %p45_p4 = scmp.eq.s32.totalorder %s1527_s4, 0 }
  0x10   : > { %s1543_s28 = scalar_select %p29_p1, %s1453_s22, %s31_s26  }
  0x11   : > { %p1545_p5 = por %p39_p2, %p38_p0  ;;  %p1551_p6 = por %p45_p4, %p44_p3 }
  0x12   : > { %p152_p7 = scmp.eq.s32.totalorder %s1527_s4, 3  ;;  %p158_p8 = scmp.eq.s32.totalorder %s1151_s24, 3 }
  0x13   : > { %p1152_p9 = scmp.ge.s32.totalorder %s1457_s23, 1  ;;  %p165_p10 = scmp.lt.s32.totalorder %s1457_s23, 5 }
  0x14   : > { %p1558_p11 = por %p152_p7, %p38_p0  ;;  %p1562_p12 = por %p158_p8, %p44_p3 }
  0x15   : > { %p1566_p13 = pnand %p1152_p9, %p165_p10  ;;  %s2692_s2 = sld [smem:[#allocation63_spill]] }
  0x16   : > { %p1248_p0 = scmp.lt.s32.totalorder %s1457_s23, 4  ;;  %s2693_s3 = sld [smem:[#allocation64_spill]] }
  0x17   : > { %p1231_p1 = pneg %p1566_p13  ;;  %s1459_s16 = smov [#allocation7]  }
  0x18   : > { %p1583_p3 = pnand %p1248_p0, %p1545_p5  ;;  %s204_s17 = sand.u32 1, %s1453_s22  }
  0x19   : > { %p1232_p2 = pnand %p1231_p1, %p45_p4  ;;  %s1460_s18 = smov [#allocation8]  }
  0x1a   : > { %s1217_s19 = smul.u32 192, %s204_s17  ;;  %s1156_s24 = sshll.u32 %s1457_s23, 3 }
  0x1b   : > { %s180_s11 = sshll.u32 %s2692_s2, 4  ;;  %s212_s9 = scalar_lea.hbm %s2593_s0, %s1156_s24  ;;  %s181_s11 = int_to_ptr.vmem [resolvable:$true] %s180_s11 }
  0x1c   : > { %s190_s14 = sshll.u32 %s2693_s3, 4  ;;  %s213_s10 = sshll.u32 %s212_s9, 4  ;;  %s191_s14 = int_to_ptr.vmem [resolvable:$true] %s190_s14  ;;  %s214_s10 = int_to_ptr.hbm [resolvable:$true] %s213_s10 }
  0x1d   : > { %1234 = dma.vmem_to_smem (!%p1232_p2), %s181_s11, 16, %s1459_s16, [#allocation6]  }
  0x1e   : > { %1237 = dma.vmem_to_smem (!%p1232_p2), %s191_s14, 16, %s1460_s18, [#allocation9]  }
  0x1f   : > { %s208_s12 = scalar_lea.vmem [#allocation3], %s1217_s19  ;;  %s205_s13 = scalar_lea.sflag [#allocation4], %s204_s17 }
  0x20   : > { %s215_s29 = sshll.u32 %s208_s12, 4  ;;  %s1353_s2 = sshra.s32 %s214_s10, 4  ;;  %s216_s29 = int_to_ptr.vmem [resolvable:$true] %s215_s29  ;;  %s1354_s2 = int_to_ptr.hbm [resolvable:$true] %s1353_s2 }
  0x21   : > { %s1355_s3 = scalar_lea.hbm %s1354_s2, 192  ;;  %p1357_p7 = pneg %p1583_p3 }
  0x22   : > { %p1356_p5 = scmp.ne.s32.totalorder %s1354_s2, %s1355_s3  ;;  %s1360_s16 = scalar_lea.hbm %s2593_s0, 768 }
  0x23   : > { %p1361_p10 = scmp.lt.s32.totalorder %s1354_s2, %s2593_s0  ;;  %p1362_p1 = scmp.lt.s32.totalorder %s1360_s16, %s1355_s3 }
  0x24   : > { %p1358_p8 = pnand %p1357_p7, %p1356_p5 }
  0x25   : > { %p1363_p0 = por %p1362_p1, %p1361_p10 }
  0x26   : > { %p1359_p9 = pneg %p1358_p8 }
  0x28   : > { %p1364_p2 = pnand %p1363_p0, %p1359_p9 }
  0x2a   : > { %1367 = shalt.err (!%p1364_p2)
}
  0x2b   : > { %s1461_s17 = smov 512   ;;  %s1462_s19 = smov 128  }
  0x2c   : > { %s1463_s26 = smov 8   ;;  %227 = sbr.rel (%p1566_p13) target bundleno = 418 (0x1a2), region = 40 }
  0x2d   : > { %1241 = dma.hbm_to_vmem [thread:$0]  (!%p1583_p3), %s214_s10, 3072, %s216_s29, %s205_s13, %s1461_s17, %s1462_s19, %s1463_s26  }
  0x31   : > { %s1605_s27 = sand.u32 1, %s1449_s21  }
  0x32   : > { %s1218_s2 = smul.u32 192, %s1605_s27  ;;  %s230_s3 = scalar_lea.sflag [#allocation4], %s1605_s27 }
  0x34   : > { %s1609_s9 = scalar_lea.vmem [#allocation3], %s1218_s2 }
  0x35   : > { %1428 = dma.done.wait (%p1551_p6), %s230_s3, 3072  }
  0x36   : > { %1430 = vsyncadd (%p1551_p6), %s230_s3, 4294964224 }
  0x37   : > { %1432 = dma.done.wait (%p45_p4), [#allocation6], 16  }
  0x38   : > { %1434 = vsyncadd (%p45_p4), [#allocation6], 4294967280 }
  0x39   : > { %1436 = dma.done.wait (%p45_p4), [#allocation9], 16  }
  0x3a   : > { %1438 = vsyncadd (%p45_p4), [#allocation9], 4294967280 }
  0x3b   : > { %249 = sfence }
  0x3c   : > { %v1626_v0 = vld [vmem:[%s2594_s1 + $0x18] sm:$0xff]  ;;  %v1631_v1 = vld [vmem:[%s2594_s1 + $0x10] sm:$0xff]  ;;  %v1464_v2 = vmov 2   ;;  %v1465_v3 = vmov 0   ;;  %v1639_v4 = vld [vmem:[%s2594_s1 + $0x8] sm:$0xff]  ;;  %v1466_v5 = vmov 1  }
  0x3d   : > { %1302 = vset.pattern.permute.xlu2 %v1464_v2  ;;  %1300 = vset.pattern.permute.xlu1 %v1465_v3  ;;  %v1467_v6 = vmov 4   ;;  %v1650_v7 = vld [vmem:[%s2594_s1] sm:$0xff]  ;;  %v1468_v8 = vmov 3   ;;  %v1469_v9 = vmov 5   ;;  %v2599_v10 = vmov 7   ;;  %s1172_s14 = sld [smem:[#allocation7 + $0xc]] }
  0x3e   : > { %1298 = vset.pattern.permute.xlu0 %v1465_v3  ;;  %562 = vperm.xlu2 %1302, %v1626_v0   ;;  %s1173_s16 = sld [smem:[#allocation7 + $0xd]]  ;;  %v1674_v13 = vld [vmem:[%s1609_s9 + $0x18] sm:$0xff]  ;;  %v2601_v19 = vmov 6   ;;  %v1690_v20 = vld [vmem:[%s1609_s9 + $0x8] sm:$0xff]  ;;  %v1737_v38 = vld [vmem:[%s1609_s9 + $0x10] sm:$0xff]  ;;  %vm1025_vm0 = vcmask 261120  }
  0x3f   : > { %382 = vperm.xlu0 %1298, %v1626_v0   ;;  %377 = vperm.xlu1 %1300, %v1631_v1   ;;  %s1174_s18 = sld [smem:[#allocation7 + $0xe]]  ;;  %2697 = vst [vmem:[#allocation17_spill] sm:$0xff] %v1674_v13  ;;  %v1677_v14 = vld [vmem:[%s1609_s9 + $0x38] sm:$0xff]  ;;  %v1693_v21 = vld [vmem:[%s1609_s9 + $0x28] sm:$0xff]  ;;  %v1740_v39 = vld [vmem:[%s1609_s9 + $0x30] sm:$0xff] }
  0x40   : > { %s299_s24 = sld [smem:[#allocation7]]  ;;  %2698 = vst [vmem:[#allocation18_spill] sm:$0xff] %v1677_v14  ;;  %v1686_v18 = vld [vmem:[%s1609_s9 + $0x58] sm:$0xff]  ;;  %v1717_v30 = vld [vmem:[%s1609_s9 + $0x48] sm:$0xff]  ;;  %v1760_v46 = vld [vmem:[%s1609_s9 + $0x50] sm:$0xff] }
  0x41   : > { %s1160_s17 = sld [smem:[#allocation7 + $0x1]]  ;;  %2700 = vst [vmem:[#allocation20_spill] sm:$0xff] %v1686_v18  ;;  %v1706_v27 = vld [vmem:[%s1609_s9 + $0x78] sm:$0xff]  ;;  %v1745_v40 = vld [vmem:[%s1609_s9 + $0x68] sm:$0xff] }
  0x42   : > { %s1175_s19 = sld [smem:[#allocation7 + $0xf]]  ;;  %2701 = vst [vmem:[#allocation21_spill] sm:$0xff] %v1690_v20  ;;  %v1724_v32 = vld [vmem:[%s1609_s9 + $0x98] sm:$0xff]  ;;  %v1780_v55 = vld [vmem:[%s1609_s9 + $0x88] sm:$0xff] }
  0x43   : > { %v1669_v11 = vstv %s1172_s14  ;;  %s1176_s26 = sld [smem:[#allocation7 + $0x10]]  ;;  %2702 = vst [vmem:[#allocation22_spill] sm:$0xff] %v1693_v21  ;;  %v1751_v42 = vld [vmem:[%s1609_s9 + $0xb8] sm:$0xff]  ;;  %v1788_v57 = vld [vmem:[%s1609_s9 + $0xa8] sm:$0xff] }
  0x44   : > { %2695 = vst [vmem:[#allocation15_spill] sm:$0xff] %v1669_v11  ;;  %v1671_v12 = vstv %s1173_s16  ;;  %v488_v15 = vmul.f32 %v1669_v11, %v1674_v13  ;;  %s1161_s2 = sld [smem:[#allocation7 + $0x2]]  ;;  %v487_v51 = vmul.f32 %v1669_v11, %v1737_v38 }
  0x45   : > { %2696 = vst [vmem:[#allocation16_spill] sm:$0xff] %v1671_v12  ;;  %v494_v16 = vmul.f32 %v1671_v12, %v1677_v14  ;;  %v1683_v17 = vstv %s1174_s18  ;;  %s1177_s3 = sld [smem:[#allocation7 + $0x11]]  ;;  %v493_v52 = vmul.f32 %v1671_v12, %v1740_v39  ;;  %v1902_v12 = vld [vmem:[%s1609_s9 + $0x60] sm:$0xff] }
  0x46   : > { %1303 = vset.pattern.permute.xlu2 %v1465_v3  ;;  %2699 = vst [vmem:[#allocation19_spill] sm:$0xff] %v1683_v17  ;;  %v504_v23 = vmul.f32 %v1683_v17, %v1686_v18  ;;  %v1698_v24 = vstv %s299_s24  ;;  %s1162_s8 = sld [smem:[#allocation7 + $0x3]] }
  0x47   : > { %1299 = vset.pattern.permute.xlu0 %v1466_v5  ;;  %1301 = vset.pattern.permute.xlu1 %v1466_v5  ;;  %v498_v22 = vadd.f32 %v494_v16, %v488_v15  ;;  %v1700_v25 = vstv %s1160_s17  ;;  %2704 = vst [vmem:[#allocation24_spill] sm:$0xff] %v1706_v27  ;;  %s1708_s15 = sld [smem:[#allocation7 + $0x4]]  ;;  %v302_v28 = vmul.f32 %v1698_v24, %v1690_v20 }
  0x48   : > { %472 = vperm.xlu0 %1299, %v1626_v0   ;;  %468 = vperm.xlu1 %1301, %v1631_v1   ;;  %v1703_v26 = vstv %s1175_s19  ;;  %v308_v29 = vmul.f32 %v1700_v25, %v1693_v21  ;;  %s1714_s30 = sld [smem:[#allocation7 + $0x5]]  ;;  %2705 = vst [vmem:[#allocation25_spill] sm:$0xff] %v1717_v30  ;;  %v303_v47 = vmul.f32 %v1698_v24, %v1737_v38 }
  0x49   : > { %372 = vperm.xlu2 %1303, %v1639_v4   ;;  %2703 = vst [vmem:[#allocation23_spill] sm:$0xff] %v1703_v26  ;;  %s1719_s10 = sld [smem:[#allocation7 + $0x6]]  ;;  %v1721_v31 = vstv %s1176_s26  ;;  %v508_v33 = vadd.f32 %v504_v23, %v498_v22  ;;  %v514_v34 = vmul.f32 %v1703_v26, %v1706_v27  ;;  %v309_v48 = vmul.f32 %v1700_v25, %v1740_v39  ;;  %v1825_v23 = vld [vmem:[%s1609_s9 + $0xb0] sm:$0xff] }
  0x4a   : > { %2706 = vst [vmem:[#allocation26_spill] sm:$0xff] %v1721_v31  ;;  %v1728_v35 = vstv %s1161_s2  ;;  %s1730_s12 = sld [smem:[#allocation7 + $0x7]]  ;;  %v312_v36 = vadd.f32 %v308_v29, %v302_v28  ;;  %v524_v43 = vmul.f32 %v1721_v31, %v1724_v32  ;;  %v304_v59 = vmul.f32 %v1698_v24, %v1674_v13 }
  0x4b   : > { %2707 = vst [vmem:[#allocation27_spill] sm:$0xff] %v1728_v35  ;;  %s1732_s29 = sld [smem:[#allocation8 + $0x2]]  ;;  %v318_v37 = vmul.f32 %v1728_v35, %v1717_v30  ;;  %v1748_v41 = vstv %s1177_s3  ;;  %v518_v44 = vadd.f32 %v514_v34, %v508_v33  ;;  %v319_v58 = vmul.f32 %v1728_v35, %v1760_v46 }
  0x4c   : > { %2708 = vst [vmem:[#allocation28_spill] sm:$0xff] %v1737_v38  ;;  %s1742_s13 = sld [smem:[#allocation8]]  ;;  %v1757_v45 = vstv %s1162_s8  ;;  %v534_v53 = vmul.f32 %v1748_v41, %v1751_v42  ;;  %v310_v60 = vmul.f32 %v1700_v25, %v1677_v14  ;;  %v313_v62 = vadd.f32 %v309_v48, %v303_v47  ;;  %v1849_v47 = vld [vmem:[%s1609_s9] sm:$0xff] }
  0x4d   : > { %2709 = vst [vmem:[#allocation29_spill] sm:$0xff] %v1740_v39  ;;  %s1755_s11 = sld [smem:[#allocation7 + $0x8]]  ;;  %v322_v49 = vadd.f32 %v318_v37, %v312_v36  ;;  %v328_v50 = vmul.f32 %v1757_v45, %v1745_v40  ;;  %v1777_v54 = vstv %s1708_s15  ;;  %v528_v61 = vadd.f32 %v524_v43, %v518_v44  ;;  %v1852_v48 = vld [vmem:[%s1609_s9 + $0x20] sm:$0xff] }
  0x4e   : > { %2710 = vst [vmem:[#allocation30_spill] sm:$0xff] %v1748_v41  ;;  %s1782_s14 = sld [smem:[#allocation7 + $0x9]]  ;;  %v1785_v56 = vstv %s1714_s30  ;;  %v320_v28 = vmul.f32 %v1728_v35, %v1686_v18  ;;  %v314_v29 = vadd.f32 %v310_v60, %v304_v59  ;;  %v323_v43 = vadd.f32 %v319_v58, %v313_v62 }
  0x4f   : > { %2711 = vst [vmem:[#allocation31_spill] sm:$0xff] %v1757_v45  ;;  %v1797_v63 = vstv %s1719_s10  ;;  %s1812_s16 = sld [smem:[#allocation7 + $0xa]]  ;;  %v1822_v22 = vmul.f32 %v1785_v56, %v1788_v57  ;;  %v1842_v37 = vadd.f32 %v534_v53, %v528_v61  ;;  %v2724_v35 = vmov 6  }
  0x50   : > { %1309 = vset.pattern.permute.xlu0 %v1467_v6  ;;  %464 = vperm.xlu1 %1301, %v1639_v4   ;;  %2712 = vst [vmem:[#allocation32_spill] sm:$0xff] %v1760_v46  ;;  %s1829_s18 = sld [smem:[#allocation7 + $0xb]]  ;;  %v398_v34 = vmul.f32 %v1797_v63, %v1674_v13  ;;  %v395_v58 = vmul.f32 %v1797_v63, %v1849_v47 }
  0x51   : > { %1304 = vset.pattern.permute.xlu2 %v1464_v2  ;;  %742 = vperm.xlu0 %1309, %v1626_v0   ;;  %2713 = vst [vmem:[#allocation33_spill] sm:$0xff] %v1777_v54  ;;  %v1815_v15 = vstv %s1732_s29  ;;  %s1839_s24 = sld [smem:[#allocation7 + $0x12]]  ;;  %v324_v62 = vadd.f32 %v320_v28, %v314_v29 }
  0x52   : > { %558 = vperm.xlu2 %1304, %v1631_v1   ;;  %2714 = vst [vmem:[#allocation34_spill] sm:$0xff] %v1785_v56  ;;  %v1818_v16 = vstv %s1742_s13  ;;  %s1854_s17 = sld [smem:[#allocation7 + $0x13]] }
  0x53   : > { %2716 = vst [vmem:[#allocation36_spill] sm:$0xff] %v1815_v15  ;;  %v1833_v33 = vstv %s1755_s11  ;;  %s1860_s19 = sld [smem:[#allocation7 + $0x14]] }
  0x54   : > { %2717 = vst [vmem:[#allocation37_spill] sm:$0xff] %v1818_v16  ;;  %v1864_v53 = vstv %s1782_s14  ;;  %v414_v60 = vmul.f32 %v1833_v33, %v1686_v18  ;;  %s1895_s26 = sld [smem:[#allocation7 + $0x15]] }
  0x55   : > { %2718 = vst [vmem:[#allocation38_spill] sm:$0xff] %v1825_v23  ;;  %s1924_s2 = sld [smem:[#allocation7 + $0x16]] }
  0x56   : > { %2719 = vst [vmem:[#allocation39_spill] sm:$0xff] %v1849_v47  ;;  %s1926_s3 = sld [smem:[#allocation8 + $0x1]] }
  0x57   : > { %2720 = vst [vmem:[#allocation40_spill] sm:$0xff] %v1852_v48  ;;  %s1938_s8 = sld [smem:[#allocation7 + $0x17]] }
  0x58   : > { %1305 = vset.pattern.permute.xlu1 %v1465_v3  ;;  %v1805_v3 = vld [vmem:[%s1609_s9 + $0x70] sm:$0xff]  ;;  %2722 = vst [vmem:[#allocation42_spill] sm:$0xff] %v1902_v12  ;;  %s1948_s15 = sld [smem:[#allocation7 + $0x18]] }
  0x59   : > { %1310 = vset.pattern.permute.xlu0 %v1468_v8  ;;  %367 = vperm.xlu1 %1305, %v1650_v7   ;;  %v423_v11 = vmul.f32 %v1864_v53, %v1805_v3  ;;  %s1957_s30 = sld [smem:[#allocation7 + $0x19]] }
  0x5a   : > { %1306 = vset.pattern.permute.xlu2 %v1466_v5  ;;  %652 = vperm.xlu0 %1310, %v1626_v0   ;;  %v1808_v5 = vld [vmem:[%s1609_s9 + $0x90] sm:$0xff]  ;;  %s1970_s10 = sld [smem:[#allocation8 + $0x3]] }
  0x5b   : > { %460 = vperm.xlu2 %1306, %v1650_v7   ;;  %2715 = vst [vmem:[#allocation35_spill] sm:$0xff] %v1808_v5  ;;  %v339_v44 = vmul.f32 %v1777_v54, %v1808_v5  ;;  %v523_v61 = vmul.f32 %v1721_v31, %v1808_v5  ;;  %v1889_v31 = vstv %s1812_s16  ;;  %s1993_s29 = sld [smem:[#allocation7 + $0x1c]] }
  0x5c   : > { %s2004_s13 = sld [smem:[#allocation7 + $0x1d]] }
  0x5d   : > { %s2027_s11 = sld [smem:[#allocation8 + $0x4]] }
  0x5e   : > { %s2036_s14 = sld [smem:[#allocation7 + $0x1e]] }
  0x5f   : > { %s2044_s16 = sld [smem:[#allocation7 + $0x1f]] }
  0x61   : > { %1307 = vset.pattern.permute.xlu1 %v1464_v2  ;;  %v338_v2 = vmul.f32 %v1777_v54, %v1780_v55 }
  0x62   : > { %554 = vperm.xlu1 %1307, %v1639_v4   ;;  %640 = vperm.xlu0 %1310, %v1650_v7  }
  0x63   : > { %1308 = vset.pattern.permute.xlu2 %v1468_v8  ;;  %v503_v8 = vmul.f32 %v1683_v17, %v1760_v46 }
  0x64   : > { %648 = vperm.xlu2 %1308, %v1631_v1  }
  0x6a   : > { %550 = vperm.xlu1 %1307, %v1650_v7   ;;  %1315 = vset.pattern.permute.xlu0 %v1469_v9 }
  0x6b   : > { %824 = vperm.xlu0 %1315, %v1639_v4  }
  0x6c   : > { %644 = vperm.xlu2 %1308, %v1639_v4  }
  0x72   : > { %1311 = vset.pattern.permute.xlu1 %v1467_v6 }
  0x73   : > { %738 = vperm.xlu1 %1311, %v1631_v1   ;;  %1319 = vset.pattern.permute.xlu0 %v2599_v10 }
  0x74   : > { %1312 = vset.pattern.permute.xlu2 %v1469_v9  ;;  %1008 = vperm.xlu0 %1319, %v1631_v1  }
  0x75   : > { %832 = vperm.xlu2 %1312, %v1626_v0  }
  0x7b   : > { %734 = vperm.xlu1 %1311, %v1639_v4  }
  0x7d   : > { %828 = vperm.xlu2 %1312, %v1631_v1  }
  0x83   : > { %1313 = vset.pattern.permute.xlu1 %v2601_v19 }
  0x84   : > { %922 = vperm.xlu1 %1313, %v1626_v0  }
  0x85   : > { %1314 = vset.pattern.permute.xlu2 %v1467_v6  ;;  %v497_v6 = vadd.f32 %v493_v52, %v487_v51  ;;  %v513_v51 = vmul.f32 %v1703_v26, %v1805_v3  ;;  %v349_v52 = vmul.f32 %v1785_v56, %v1825_v23  ;;  %v397_v26 = vmul.f32 %v1797_v63, %v1737_v38 }
  0x86   : > { %730 = vperm.xlu2 %1314, %v1650_v7  }
  0x8c   : > { %918 = vperm.xlu1 %1313, %v1631_v1   ;;  %v332_v1 = vadd.f32 %v328_v50, %v322_v49  ;;  %v507_v50 = vadd.f32 %v503_v8, %v497_v6 }
  0x8e   : > { %1316 = vset.pattern.permute.xlu2 %v2599_v10  ;;  %v342_v49 = vadd.f32 %v338_v2, %v332_v1  ;;  %v330_v1 = vmul.f32 %v1757_v45, %v1706_v27  ;;  %v1878_v2 = vld [vmem:[%s1609_s9 + $0x40] sm:$0xff]  ;;  %v533_v10 = vmul.f32 %v1748_v41, %v1825_v23  ;;  %v517_v29 = vadd.f32 %v513_v51, %v507_v50 }
  0x8f   : > { %1012 = vperm.xlu2 %1316, %v1626_v0   ;;  %v1800_v0 = vstv %s1730_s12  ;;  %2721 = vst [vmem:[#allocation41_spill] sm:$0xff] %v1878_v2  ;;  %v340_v51 = vmul.f32 %v1777_v54, %v1724_v32  ;;  %v433_v54 = vmul.f32 %v1889_v31, %v1808_v5  ;;  %s1977_s12 = sld [smem:[#allocation7 + $0x1a]] }
  0x90   : > { %v404_v36 = vmul.f32 %v1800_v0, %v1677_v14  ;;  %v401_v59 = vmul.f32 %v1800_v0, %v1852_v48  ;;  %v403_v28 = vmul.f32 %v1800_v0, %v1740_v39  ;;  %v334_v50 = vadd.f32 %v330_v1, %v324_v62 }
  0x91   : > { %v527_v62 = vadd.f32 %v523_v61, %v517_v29  ;;  %v1917_v1 = vstv %s1829_s18  ;;  %v2727_v61 = vmov 7   ;;  %s2053_s18 = sld [smem:[#allocation7 + $0x20]] }
  0x92   : > { %v408_v6 = vadd.f32 %v404_v36, %v398_v34  ;;  %v424_v34 = vmul.f32 %v1864_v53, %v1706_v27  ;;  %v413_v36 = vmul.f32 %v1833_v33, %v1760_v46  ;;  %v407_v17 = vadd.f32 %v403_v28, %v397_v26 }
  0x93   : > { %v1913_v26 = vstv %s1854_s17  ;;  %v1922_v28 = vstv %s1860_s19  ;;  %v344_v29 = vadd.f32 %v340_v51, %v334_v50  ;;  %v444_v50 = vmul.f32 %v1917_v1, %v1751_v42  ;;  %s2115_s17 = sld [smem:[#allocation7 + $0x22]] }
  0x94   : > { %1317 = vset.pattern.permute.xlu1 %v1469_v9  ;;  %v329_v9 = vmul.f32 %v1757_v45, %v1805_v3  ;;  %v418_v41 = vadd.f32 %v414_v60, %v408_v6  ;;  %v1907_v45 = vstv %s1839_s24  ;;  %v417_v60 = vadd.f32 %v413_v36, %v407_v17  ;;  %2725 = vst [vmem:[#allocation44_spill] sm:$0xff] %v1913_v26  ;;  %v1934_v36 = vld [vmem:[%s1609_s9 + $0x80] sm:$0xff]  ;;  %s2082_s24 = sld [smem:[#allocation7 + $0x21]] }
  0x95   : > { %820 = vperm.xlu1 %1317, %v1650_v7   ;;  %2723 = vst [vmem:[#allocation43_spill] sm:$0xff] %v1907_v45  ;;  %v434_v6 = vmul.f32 %v1889_v31, %v1724_v32  ;;  %v421_v17 = vmul.f32 %v1864_v53, %v1902_v12  ;;  %v1953_v51 = vstv %s1895_s26  ;;  %s2142_s19 = sld [smem:[#allocation7 + $0x23]] }
  0x96   : > { %2726 = vst [vmem:[#allocation45_spill] sm:$0xff] %v1922_v28  ;;  %s2180_s26 = sld [smem:[#allocation8 + $0x5]] }
  0x97   : > { %1318 = vset.pattern.permute.xlu2 %v2601_v19  ;;  %v333_v19 = vadd.f32 %v329_v9, %v323_v43  ;;  %v405_v43 = vadd.f32 %v401_v59, %v395_v58  ;;  %v411_v9 = vmul.f32 %v1833_v33, %v1878_v2  ;;  %v350_v59 = vmul.f32 %v1785_v56, %v1751_v42 }
  0x98   : > { %914 = vperm.xlu2 %1318, %v1639_v4   ;;  %v1880_v8 = vpop.permute.xlu2 %562  ;;  %2728 = vst [vmem:[#allocation46_spill] sm:$0xff] %v1934_v36  ;;  %v427_v56 = vadd.f32 %v423_v11, %v417_v60  ;;  %v593_v11 = vmul.f32 %v1922_v28, %v1760_v46  ;;  %v537_v46 = vadd.f32 %v533_v10, %v527_v62 }
  0x99   : > { %v343_v58 = vadd.f32 %v339_v44, %v333_v19  ;;  %v415_v19 = vadd.f32 %v411_v9, %v405_v43  ;;  %v577_v44 = vmul.f32 %v1907_v45, %v1737_v38  ;;  %v583_v43 = vmul.f32 %v1913_v26, %v1740_v39  ;;  %2729 = vst [vmem:[#allocation47_spill] sm:$0xff] %v1953_v51  ;;  %v1966_v38 = vld [vmem:[%s1609_s9 + $0xa0] sm:$0xff]  ;;  %s1985_s9 = sld [smem:[#allocation7 + $0x1b]] }
  0x9a   : > { %v354_v39 = vadd.f32 %v350_v59, %v344_v29  ;;  %2730 = vst [vmem:[#allocation48_spill] sm:$0xff] %v1966_v38  ;;  %v1996_v29 = vadd.f32 %v1815_v15, %v537_v46  ;;  %v422_v46 = vmul.f32 %v1864_v53, %v1745_v40 }
  0x9b   : > { %v353_v9 = vadd.f32 %v349_v52, %v343_v58  ;;  %v587_v60 = vadd.f32 %v583_v43, %v577_v44  ;;  %v402_v58 = vmul.f32 %v1800_v0, %v1693_v21  ;;  %v437_v44 = vadd.f32 %v433_v54, %v427_v56 }
  0x9c   : > { %v1981_v0 = vstv %s1924_s2  ;;  %v412_v56 = vmul.f32 %v1833_v33, %v1717_v30  ;;  %v1999_v33 = vadd.f32 %v1818_v16, %v354_v39  ;;  %v2002_v43 = vstv %s1926_s3  ;;  %s2217_s2 = sld [smem:[#allocation7 + $0x2a]] }
  0x9d   : > { %1320 = vset.pattern.permute.xlu1 %v2724_v35  ;;  %v428_v35 = vadd.f32 %v424_v34, %v418_v41  ;;  %v544_v41 = vadd.f32 %v1815_v15, %v1842_v37  ;;  %v352_v34 = vadd.f32 %v1822_v22, %v342_v49  ;;  %v396_v37 = vmul.f32 %v1797_v63, %v1690_v20  ;;  %s2226_s3 = sld [smem:[#allocation7 + $0x2b]] }
  0x9e   : > { %910 = vperm.xlu1 %1320, %v1650_v7   ;;  %v425_v22 = vadd.f32 %v421_v17, %v415_v19  ;;  %v431_v49 = vmul.f32 %v1889_v31, %v1934_v36  ;;  %v443_v63 = vmul.f32 %v1917_v1, %v1825_v23  ;;  %v597_v17 = vadd.f32 %v593_v11, %v587_v60 }
  0x9f   : > { %v438_v52 = vadd.f32 %v434_v6, %v428_v35  ;;  %v1973_v19 = vadd.f32 %v1818_v16, %v352_v34  ;;  %v603_v6 = vmul.f32 %v1953_v51, %v1805_v3  ;;  %v548_v10 = vmax.f32 %v544_v41, 0.0  ;;  %2731 = vst [vmem:[#allocation49_spill] sm:$0xff] %v1981_v0 }
  0xa0   : > { %1321 = vset.pattern.permute.xlu2 %v2727_v61  ;;  %v406_v54 = vadd.f32 %v402_v58, %v396_v37  ;;  %v1989_v59 = vadd.f32 %v1818_v16, %v353_v9  ;;  %v435_v62 = vadd.f32 %v431_v49, %v425_v22  ;;  %v441_v35 = vmul.f32 %v1917_v1, %v1966_v38 }
  0xa1   : > { %1004 = vperm.xlu2 %1321, %v1639_v4   ;;  %v2008_v34 = vstv %s1938_s8  ;;  %v607_v9 = vadd.f32 %v603_v6, %v597_v17  ;;  %v613_v11 = vmul.f32 %v1981_v0, %v1808_v5  ;;  %v2015_v60 = vstv %s1948_s15  ;;  %s2236_s8 = sld [smem:[#allocation7 + $0x2c]] }
  0xa2   : > { %2732 = vst [vmem:[#allocation50_spill] sm:$0xff] %v2015_v60  ;;  %v2018_v39 = vstv %s1957_s30  ;;  %v2021_v37 = vmul.f32 %v1880_v8, %v548_v10  ;;  %v445_v49 = vadd.f32 %v441_v35, %v435_v62  ;;  %v623_v8 = vmul.f32 %v2008_v34, %v1825_v23  ;;  %s2245_s15 = sld [smem:[#allocation7 + $0x2d]] }
  0xa3   : > { %v1959_v4 = vpop.permute.xlu2 %372  ;;  %2733 = vst [vmem:[#allocation51_spill] sm:$0xff] %v2018_v39  ;;  %v617_v17 = vadd.f32 %v613_v11, %v607_v9  ;;  %v432_v6 = vmul.f32 %v1889_v31, %v1780_v55  ;;  %v668_v10 = vmul.f32 %v2015_v60, %v1674_v13  ;;  %v2047_v62 = vstv %s1977_s12  ;;  %s2262_s30 = sld [smem:[#allocation7 + $0x2e]] }
  0xa4   : > { %2734 = vst [vmem:[#allocation52_spill] sm:$0xff] %v2021_v37  ;;  %v576_v35 = vmul.f32 %v1907_v45, %v1690_v20  ;;  %v2056_v31 = vadd.f32 %v2002_v43, %v445_v49  ;;  %v442_v9 = vmul.f32 %v1917_v1, %v1788_v57  ;;  %v2065_v11 = vstv %s1985_s9  ;;  %s2325_s12 = sld [smem:[#allocation7 + $0x24]] }
  0xa5   : > { %2735 = vst [vmem:[#allocation53_spill] sm:$0xff] %v2047_v62  ;;  %v578_v41 = vmul.f32 %v1907_v45, %v1674_v13  ;;  %v627_v49 = vadd.f32 %v623_v8, %v617_v17  ;;  %v592_v15 = vmul.f32 %v1922_v28, %v1717_v30  ;;  %v301_v8 = vmul.f32 %v1698_v24, %v1849_v47  ;;  %s2331_s9 = sld [smem:[#allocation7 + $0x25]] }
  0xa6   : > { %1322 = vset.pattern.permute.xlu1 %v2727_v61  ;;  %v448_v61 = vadd.f32 %v444_v50, %v438_v52  ;;  %v416_v50 = vadd.f32 %v412_v56, %v406_v54  ;;  %v674_v54 = vmul.f32 %v2018_v39, %v1677_v14  ;;  %2736 = vst [vmem:[#allocation54_spill] sm:$0xff] %v2056_v31  ;;  %v2113_v23 = vstv %s2053_s18  ;;  %s1206_s18 = sld [smem:[#allocation8 + $0x6]] }
  0xa7   : > { %1000 = vperm.xlu1 %1322, %v1650_v7   ;;  %v447_v7 = vadd.f32 %v443_v63, %v437_v44  ;;  %v547_v44 = vmax.f32 %v1996_v29, 0.0  ;;  %2738 = vst [vmem:[#allocation56_spill] sm:$0xff] %v2065_v11  ;;  %v684_v29 = vmul.f32 %v2047_v62, %v1686_v18  ;;  %v584_v31 = vmul.f32 %v1913_v26, %v1677_v14 }
  0xa8   : > { %v2025_v52 = vadd.f32 %v2002_v43, %v448_v61  ;;  %v426_v56 = vadd.f32 %v422_v46, %v416_v50  ;;  %v582_v61 = vmul.f32 %v1913_v26, %v1693_v21  ;;  %v2068_v50 = vstv %s1993_s29  ;;  %2744 = vst [vmem:[#allocation62_spill] sm:$0xff] %v2113_v23  ;;  %s2336_s29 = sld [smem:[#allocation7 + $0x26]] }
  0xa9   : > { %v2032_v63 = vadd.f32 %v2002_v43, %v447_v7  ;;  %v2060_v7 = vstv %s1970_s10  ;;  %2739 = vst [vmem:[#allocation57_spill] sm:$0xff] %v2068_v50  ;;  %v2071_v46 = vstv %s2004_s13  ;;  %v678_v22 = vadd.f32 %v674_v54, %v668_v10  ;;  %s2291_s10 = sld [smem:[#allocation7 + $0x2f]] }
  0xaa   : > { %2737 = vst [vmem:[#allocation55_spill] sm:$0xff] %v2060_v7  ;;  %v436_v39 = vadd.f32 %v432_v6, %v426_v56  ;;  %v586_v60 = vadd.f32 %v582_v61, %v576_v35  ;;  %v307_v17 = vmul.f32 %v1700_v25, %v1852_v48  ;;  %v588_v10 = vadd.f32 %v584_v31, %v578_v41  ;;  %s2338_s13 = sld [smem:[#allocation8 + $0x7]] }
  0xab   : > { %2740 = vst [vmem:[#allocation58_spill] sm:$0xff] %v2071_v46  ;;  %v594_v54 = vmul.f32 %v1922_v28, %v1686_v18  ;;  %v2091_v6 = vstv %s2027_s11  ;;  %v694_v56 = vmul.f32 %v2065_v11, %v1706_v27  ;;  %v704_v35 = vmul.f32 %v2068_v50, %v1724_v32  ;;  %s2352_s11 = sld [smem:[#allocation7 + $0x27]] }
  0xac   : > { %v559_v58 = vpop.permute.xlu2 %558  ;;  %v714_v61 = vmul.f32 %v2071_v46, %v1751_v42  ;;  %v2102_v1 = vadd.f32 %v2060_v7, %v627_v49  ;;  %v688_v25 = vadd.f32 %v684_v29, %v678_v22  ;;  %v602_v41 = vmul.f32 %v1953_v51, %v1745_v40 }
  0xad   : > { %v2107_v31 = vstv %s2036_s14  ;;  %v446_v62 = vadd.f32 %v442_v9, %v436_v39  ;;  %v596_v28 = vadd.f32 %v592_v15, %v586_v60  ;;  %v2110_v11 = vstv %s2044_s16  ;;  %s2376_s14 = sld [smem:[#allocation7 + $0x28]] }
  0xae   : > { %2742 = vst [vmem:[#allocation60_spill] sm:$0xff] %v2107_v31  ;;  %v311_v50 = vadd.f32 %v307_v17, %v301_v8  ;;  %v598_v22 = vadd.f32 %v594_v54, %v588_v10  ;;  %v604_v29 = vmul.f32 %v1953_v51, %v1706_v27  ;;  %v2121_v26 = vmul.f32 %v559_v58, %v547_v44  ;;  %s2386_s16 = sld [smem:[#allocation7 + $0x29]] }
  0xaf   : > { %2743 = vst [vmem:[#allocation61_spill] sm:$0xff] %v2110_v11  ;;  %v612_v15 = vmul.f32 %v1981_v0, %v1780_v55  ;;  %v622_v60 = vmul.f32 %v2008_v34, %v1788_v57  ;;  %v758_v39 = vmul.f32 %v2107_v31, %v1674_v13  ;;  %v698_v8 = vadd.f32 %v694_v56, %v688_v25 }
  0xb0   : > { %v764_v17 = vmul.f32 %v2110_v11, %v1677_v14  ;;  %v774_v10 = vmul.f32 %v2113_v23, %v1686_v18  ;;  %v2135_v44 = vadd.f32 %v2002_v43, %v446_v62  ;;  %v606_v54 = vadd.f32 %v602_v41, %v596_v28  ;;  %v2747_v18 = vld [vmem:[#allocation33_spill] sm:$0xff]  ;;  %v2748_v43 = vld [vmem:[#allocation15_spill] sm:$0xff]  ;;  %v2749_v62 = vld [vmem:[#allocation16_spill] sm:$0xff] }
  0xb1   : > { %v378_v53 = vpop.permute.xlu1 %377  ;;  %v383_v46 = vpop.permute.xlu0 %382  ;;  %v2140_v45 = vstv %s2082_s24  ;;  %v608_v25 = vadd.f32 %v604_v29, %v598_v22  ;;  %v614_v9 = vmul.f32 %v1981_v0, %v1724_v32  ;;  %v337_v13 = vmul.f32 %v2747_v18, %v1934_v36  ;;  %s1023_s24 = sld [smem:[#allocation2]] }
  0xb2   : > { %v768_v14 = vadd.f32 %v764_v17, %v758_v39  ;;  %v486_v28 = vmul.f32 %v2748_v43, %v1690_v20  ;;  %v492_v41 = vmul.f32 %v2749_v62, %v1693_v21  ;;  %v784_v29 = vmul.f32 %v2140_v45, %v1706_v27  ;;  %v2753_v21 = vld [vmem:[#allocation23_spill] sm:$0xff] }
  0xb3   : > { %v2752_v39 = vmax.f32 %v1989_v59, 0.0  ;;  %v2161_v0 = vstv %s2115_s17  ;;  %v512_v36 = vmul.f32 %v2753_v21, %v1745_v40  ;;  %v2755_v59 = vld [vmem:[#allocation28_spill] sm:$0xff] }
  0xb4   : > { %v778_v22 = vadd.f32 %v774_v10, %v768_v14  ;;  %v496_v20 = vadd.f32 %v492_v41, %v486_v28  ;;  %v624_v14 = vmul.f32 %v2008_v34, %v1751_v42  ;;  %v2754_v10 = vmax.f32 %v2032_v63, 0.0 }
  0xb5   : > { %v2099_v24 = vpop.permute.xlu2 %460  ;;  %v387_v18 = vmul.f32 %v378_v53, %v2752_v39  ;;  %v757_v53 = vmul.f32 %v2107_v31, %v2755_v59  ;;  %v2756_v39 = vld [vmem:[#allocation29_spill] sm:$0xff] }
  0xb6   : > { %2741 = vst [vmem:[#allocation59_spill] sm:$0xff] %v2099_v24  ;;  %v2745_v24 = vld [vmem:[#allocation27_spill] sm:$0xff]  ;;  %v763_v28 = vmul.f32 %v2110_v11, %v2756_v39  ;;  %v788_v16 = vadd.f32 %v784_v29, %v778_v22  ;;  %v2759_v22 = vmax.f32 %v1999_v33, 0.0 }
  0xb7   : > { %v317_v49 = vmul.f32 %v2745_v24, %v1878_v2  ;;  %v2746_v24 = vld [vmem:[#allocation31_spill] sm:$0xff] }
  0xb8   : > { %v327_v51 = vmul.f32 %v2746_v24, %v1902_v12  ;;  %v2750_v24 = vld [vmem:[#allocation19_spill] sm:$0xff]  ;;  %v708_v12 = vadd.f32 %v704_v35, %v698_v8  ;;  %v618_v8 = vadd.f32 %v614_v9, %v608_v25  ;;  %v388_v29 = vmul.f32 %v383_v46, %v2759_v22  ;;  %v2761_v46 = vld [vmem:[#allocation30_spill] sm:$0xff] }
  0xb9   : > { %v321_v56 = vadd.f32 %v317_v49, %v311_v50  ;;  %v502_v37 = vmul.f32 %v2750_v24, %v1717_v30  ;;  %v2751_v50 = vld [vmem:[#allocation34_spill] sm:$0xff]  ;;  %v616_v30 = vadd.f32 %v612_v15, %v606_v54  ;;  %v2757_v15 = vld [vmem:[#allocation32_spill] sm:$0xff] }
  0xba   : > { %v469_v58 = vpop.permute.xlu1 %468  ;;  %v347_v49 = vmul.f32 %v2751_v50, %v1966_v38  ;;  %v473_v41 = vpop.permute.xlu0 %472  ;;  %v718_v38 = vadd.f32 %v714_v61, %v708_v12  ;;  %v773_v9 = vmul.f32 %v2113_v23, %v2757_v15  ;;  %v485_v12 = vmul.f32 %v2748_v43, %v1849_v47 }
  0xbb   : > { %v331_v35 = vadd.f32 %v327_v51, %v321_v56  ;;  %v477_v50 = vmul.f32 %v469_v58, %v2754_v10  ;;  %v506_v27 = vadd.f32 %v502_v37, %v496_v20  ;;  %v794_v51 = vmul.f32 %v2161_v0, %v1724_v32  ;;  %v2758_v37 = vld [vmem:[#allocation26_spill] sm:$0xff] }
  0xbc   : > { %v2178_v56 = vstv %s2142_s19  ;;  %v522_v63 = vmul.f32 %v2758_v37, %v1780_v55  ;;  %v767_v58 = vadd.f32 %v763_v28, %v757_v53  ;;  %v626_v25 = vadd.f32 %v622_v60, %v616_v30 }
  0xbd   : > { %v516_v20 = vadd.f32 %v512_v36, %v506_v27  ;;  %v341_v10 = vadd.f32 %v337_v13, %v331_v35  ;;  %v491_v61 = vmul.f32 %v2749_v62, %v1852_v48  ;;  %v2760_v23 = vmax.f32 %v2025_v52, 0.0 }
  0xbe   : > { %v649_v17 = vpop.permute.xlu2 %648  ;;  %v481_v31 = vadd.f32 %v477_v50, %v387_v18  ;;  %v628_v27 = vadd.f32 %v624_v14, %v618_v8  ;;  %v798_v36 = vadd.f32 %v794_v51, %v788_v16  ;;  %v804_v53 = vmul.f32 %v2178_v56, %v1751_v42 }
  0xbf   : > { %v478_v11 = vmul.f32 %v473_v41, %v2760_v23  ;;  %v777_v30 = vadd.f32 %v773_v9, %v767_v58  ;;  %v783_v13 = vmul.f32 %v2140_v45, %v1805_v3  ;;  %v456_v60 = vmax.f32 %v2135_v44, 0.0 }
  0xc0   : > { %v724_v43 = vadd.f32 %v2091_v6, %v718_v38  ;;  %v526_v33 = vadd.f32 %v522_v63, %v516_v20  ;;  %v532_v52 = vmul.f32 %v2761_v46, %v1788_v57  ;;  %v632_v23 = vadd.f32 %v2060_v7, %v626_v25 }
  0xc1   : > { %v351_v16 = vadd.f32 %v347_v49, %v341_v10  ;;  %v495_v18 = vadd.f32 %v491_v61, %v485_v12  ;;  %v501_v35 = vmul.f32 %v2750_v24, %v1878_v2  ;;  %v2762_v8 = vmax.f32 %v1973_v19, 0.0  ;;  %v2769_v61 = vld [vmem:[#allocation43_spill] sm:$0xff] }
  0xc2   : > { %v465_v54 = vpop.permute.xlu1 %464  ;;  %v482_v44 = vadd.f32 %v478_v11, %v388_v29  ;;  %v571_v38 = vadd.f32 %v2121_v26, %v481_v31  ;;  %v2208_v50 = vadd.f32 %v2060_v7, %v628_v27  ;;  %v2763_v28 = vmax.f32 %v2102_v1, 0.0  ;;  %v2765_v31 = vld [vmem:[#allocation37_spill] sm:$0xff]  ;;  %v2770_v29 = vld [vmem:[#allocation44_spill] sm:$0xff] }
  0xc3   : > { %v386_v14 = vmul.f32 %v1959_v4, %v2762_v8  ;;  %v808_v51 = vadd.f32 %v804_v53, %v798_v36  ;;  %v787_v9 = vadd.f32 %v783_v13, %v777_v30  ;;  %v793_v49 = vmul.f32 %v2161_v0, %v1808_v5  ;;  %v743_v24 = vpop.permute.xlu0 %742  ;;  %v2772_v30 = vld [vmem:[#allocation38_spill] sm:$0xff] }
  0xc4   : > { %v657_v41 = vmul.f32 %v649_v17, %v2763_v28  ;;  %v476_v20 = vmul.f32 %v465_v54, %v456_v60  ;;  %v728_v63 = vmax.f32 %v724_v43, 0.0  ;;  %v2215_v19 = vstv %s2180_s26  ;;  %v2767_v17 = vld [vmem:[#allocation42_spill] sm:$0xff]  ;;  %v2768_v54 = vld [vmem:[#allocation52_spill] sm:$0xff]  ;;  %s1059_s26 = scalar_lea.hbm %s2598_s5, %s1527_s4  ;;  %s1403_s4 = scalar_lea.hbm %s2598_s5, 4 }
  0xc5   : > { %v536_v4 = vadd.f32 %v532_v52, %v526_v33  ;;  %v636_v26 = vmax.f32 %v632_v23, 0.0  ;;  %v2222_v58 = vadd.f32 %v2765_v31, %v351_v16  ;;  %v505_v1 = vadd.f32 %v501_v35, %v495_v18  ;;  %v2773_v33 = vld [vmem:[#allocation36_spill] sm:$0xff]  ;;  %v2774_v23 = vld [vmem:[#allocation50_spill] sm:$0xff] }
  0xc6   : > { %v645_v62 = vpop.permute.xlu2 %644  ;;  %v511_v25 = vmul.f32 %v2753_v21, %v2767_v17  ;;  %v2229_v10 = vadd.f32 %v2768_v54, %v482_v44  ;;  %v638_v12 = vmax.f32 %v2208_v50, 0.0  ;;  %v575_v22 = vmul.f32 %v2769_v61, %v1849_v47  ;;  %v2775_v44 = vld [vmem:[#allocation46_spill] sm:$0xff]  ;;  %v2776_v50 = vld [vmem:[#allocation48_spill] sm:$0xff] }
  0xc7   : > { %2766 = vst [vmem:[#allocation31_spill] sm:$0xff] %v2222_v58  ;;  %v581_v27 = vmul.f32 %v2770_v29, %v1852_v48  ;;  %v2238_v36 = vadd.f32 %v657_v41, %v571_v38  ;;  %v2241_v53 = vadd.f32 %v2215_v19, %v808_v51  ;;  %v797_v21 = vadd.f32 %v793_v49, %v787_v9  ;;  %v2777_v41 = vld [vmem:[#allocation45_spill] sm:$0xff]  ;;  %v2783_v54 = vld [vmem:[#allocation56_spill] sm:$0xff] }
  0xc8   : > { %v803_v13 = vmul.f32 %v2178_v56, %v2772_v30  ;;  %v2247_v60 = vadd.f32 %v476_v20, %v386_v14  ;;  %v2249_v43 = vmul.f32 %v743_v24, %v728_v63  ;;  %v542_v52 = vadd.f32 %v2773_v33, %v536_v4  ;;  %v2779_v49 = vld [vmem:[#allocation53_spill] sm:$0xff]  ;;  %v2780_v63 = vld [vmem:[#allocation47_spill] sm:$0xff] }
  0xc9   : > { %2771 = vst [vmem:[#allocation33_spill] sm:$0xff] %v2238_v36  ;;  %v667_v16 = vmul.f32 %v2774_v23, %v2755_v59  ;;  %v2254_v18 = vmul.f32 %v645_v62, %v636_v26  ;;  %v515_v8 = vadd.f32 %v511_v25, %v505_v1  ;;  %v521_v38 = vmul.f32 %v2758_v37, %v2775_v44  ;;  %v2778_v62 = vld [vmem:[#allocation51_spill] sm:$0xff]  ;;  %v2781_v4 = vld [vmem:[#allocation49_spill] sm:$0xff] }
  0xca   : > { %v531_v28 = vmul.f32 %v2761_v46, %v2776_v50  ;;  %v585_v14 = vadd.f32 %v581_v27, %v575_v22  ;;  %v591_v51 = vmul.f32 %v2777_v41, %v1878_v2  ;;  %v673_v9 = vmul.f32 %v2778_v62, %v2756_v39 }
  0xcb   : > { %v2219_v11 = vpop.permute.xlu1 %367  ;;  %v683_v20 = vmul.f32 %v2779_v49, %v2757_v15  ;;  %v807_v37 = vadd.f32 %v803_v13, %v797_v21  ;;  %v601_v46 = vmul.f32 %v2780_v63, %v2767_v17  ;;  %v2275_v26 = vmul.f32 %v2781_v4, %v2775_v44  ;;  %v2784_v63 = vld [vmem:[#allocation57_spill] sm:$0xff] }
  0xcc   : > { %2764 = vst [vmem:[#allocation27_spill] sm:$0xff] %v2219_v11  ;;  %v546_v31 = vmax.f32 %v542_v52, 0.0  ;;  %v2279_v1 = vmul.f32 %v2008_v34, %v2776_v50  ;;  %v677_v25 = vadd.f32 %v673_v9, %v667_v16  ;;  %v693_v61 = vmul.f32 %v2783_v54, %v1805_v3  ;;  %v653_v13 = vpop.permute.xlu0 %652  ;;  %v2785_v11 = vld [vmem:[#allocation17_spill] sm:$0xff] }
  0xcd   : > { %v525_v22 = vadd.f32 %v521_v38, %v515_v8  ;;  %v665_v29 = vmul.f32 %v2774_v23, %v1849_v47  ;;  %v2286_v27 = vstv %s2217_s2  ;;  %v2289_v21 = vstv %s2226_s3  ;;  %v2791_v47 = vld [vmem:[#allocation58_spill] sm:$0xff]  ;;  %s270_s2 = scalar_lea.vmem [#allocation10], %s1605_s27 }
  0xce   : > { %2782 = vst [vmem:[#allocation15_spill] sm:$0xff] %v2279_v1  ;;  %v595_v34 = vadd.f32 %v591_v51, %v585_v14  ;;  %v671_v16 = vmul.f32 %v2778_v62, %v1852_v48  ;;  %v687_v41 = vadd.f32 %v683_v20, %v677_v25  ;;  %v2296_v9 = vstv %s2236_s8  ;;  %v2786_v25 = vld [vmem:[#allocation18_spill] sm:$0xff]  ;;  %v2790_v48 = vld [vmem:[#allocation24_spill] sm:$0xff]  ;;  %s1061_s3 = sshll.u32 %s270_s2, 4  ;;  %s1063_s8 = sshll.u32 %s1059_s26, 4  ;;  %s1062_s3 = int_to_ptr.vmem [resolvable:$true] %s1061_s3  ;;  %s1064_s8 = int_to_ptr.hbm [resolvable:$true] %s1063_s8 }
  0xcf   : > { %v2256_v35 = vpop.permute.xlu2 %832  ;;  %v2299_v8 = vadd.f32 %v2215_v19, %v807_v37  ;;  %v681_v38 = vmul.f32 %v2779_v49, %v1878_v2  ;;  %v703_v4 = vmul.f32 %v2784_v63, %v1808_v5  ;;  %v2306_v24 = vstv %s2245_s15  ;;  %v2788_v2 = vld [vmem:[#allocation20_spill] sm:$0xff]  ;;  %s1051_s15 = scalar_lea.sflag [#allocation5], %s1605_s27 }
  0xd0   : > { %v691_v14 = vmul.f32 %v2783_v54, %v2767_v17  ;;  %v697_v51 = vadd.f32 %v693_v61, %v687_v41  ;;  %v938_v20 = vmul.f32 %v2286_v27, %v2785_v11  ;;  %v944_v7 = vmul.f32 %v2289_v21, %v2786_v25 }
  0xd1   : > { %v658_v37 = vmul.f32 %v653_v13, %v638_v12  ;;  %v2318_v1 = vmul.f32 %v2784_v63, %v2775_v44  ;;  %v2321_v33 = vstv %s2262_s30  ;;  %v954_v36 = vmul.f32 %v2296_v9, %v2788_v2  ;;  %s1397_s30 = sshra.s32 %s1064_s8, 4  ;;  %s1398_s30 = int_to_ptr.hbm [resolvable:$true] %s1397_s30 }
  0xd2   : > { %v2327_v61 = vadd.f32 %v531_v28, %v525_v22  ;;  %v605_v41 = vadd.f32 %v601_v46, %v595_v34  ;;  %v948_v17 = vadd.f32 %v944_v7, %v938_v20  ;;  %v964_v12 = vmul.f32 %v2306_v24, %v2790_v48  ;;  %v2792_v46 = vld [vmem:[#allocation21_spill] sm:$0xff]  ;;  %v2793_v34 = vld [vmem:[#allocation22_spill] sm:$0xff]  ;;  %p1404_p3 = scmp.lt.s32.totalorder %s1398_s30, %s2598_s5 }
  0xd3   : > { %2787 = vst [vmem:[#allocation16_spill] sm:$0xff] %v2318_v1  ;;  %v817_v13 = vmax.f32 %v2299_v8, 0.0  ;;  %v675_v1 = vadd.f32 %v671_v16, %v665_v29  ;;  %v707_v44 = vadd.f32 %v703_v4, %v697_v51  ;;  %v713_v5 = vmul.f32 %v2791_v47, %v2772_v30  ;;  %v2794_v4 = vld [vmem:[#allocation25_spill] sm:$0xff]  ;;  %v2796_v30 = vld [vmem:[#allocation60_spill] sm:$0xff] }
  0xd4   : > { %v555_v52 = vpop.permute.xlu1 %554  ;;  %2789 = vst [vmem:[#allocation19_spill] sm:$0xff] %v2327_v61  ;;  %v958_v28 = vadd.f32 %v954_v36, %v948_v17  ;;  %v974_v7 = vmul.f32 %v2321_v33, %v1724_v32  ;;  %v666_v22 = vmul.f32 %v2774_v23, %v2792_v46  ;;  %v672_v20 = vmul.f32 %v2778_v62, %v2793_v34 }
  0xd5   : > { %v662_v29 = vadd.f32 %v658_v37, %v2229_v10  ;;  %v566_v16 = vmul.f32 %v555_v52, %v546_v31  ;;  %v2348_v8 = vstv %s2291_s10  ;;  %v682_v51 = vmul.f32 %v2779_v49, %v2794_v4  ;;  %v2798_v52 = vld [vmem:[#allocation61_spill] sm:$0xff]  ;;  %v2799_v37 = vld [vmem:[#allocation62_spill] sm:$0xff]  ;;  %s1399_s10 = scalar_lea.hbm %s1398_s30, 1 }
  0xd6   : > { %v968_v36 = vadd.f32 %v964_v12, %v958_v28  ;;  %v676_v61 = vadd.f32 %v672_v20, %v666_v22  ;;  %v692_v23 = vmul.f32 %v2783_v54, %v1745_v40  ;;  %v756_v62 = vmul.f32 %v2796_v30, %v2792_v46  ;;  %p1400_p4 = scmp.ne.s32.totalorder %s1398_s30, %s1399_s10  ;;  %p1405_p5 = scmp.lt.s32.totalorder %s1403_s4, %s1399_s10 }
  0xd7   : > { %v2314_v58 = vpop.permute.xlu2 %828  ;;  %v2362_v10 = vmul.f32 %v2791_v47, %v2776_v50  ;;  %v717_v31 = vadd.f32 %v713_v5, %v707_v44  ;;  %v762_v49 = vmul.f32 %v2798_v52, %v2793_v34  ;;  %v685_v12 = vadd.f32 %v681_v38, %v675_v1 }
  0xd8   : > { %v978_v28 = vadd.f32 %v974_v7, %v968_v36  ;;  %v984_v54 = vmul.f32 %v2348_v8, %v1751_v42  ;;  %v686_v22 = vadd.f32 %v682_v51, %v676_v61  ;;  %v752_v20 = vadd.f32 %v2249_v43, %v662_v29  ;;  %p1401_p6 = pnand %p1400_p4, %p1558_p11  ;;  %p1406_p7 = por %p1405_p5, %p1404_p3 }
  0xd9   : > { %2797 = vst [vmem:[#allocation23_spill] sm:$0xff] %v2362_v10  ;;  %v2800_v10 = vmax.f32 %v2241_v53, 0.0  ;;  %v702_v44 = vmul.f32 %v2784_v63, %v1780_v55  ;;  %v766_v50 = vadd.f32 %v762_v49, %v756_v62  ;;  %v570_v1 = vadd.f32 %v566_v16, %v2247_v60 }
  0xda   : > { %v696_v7 = vadd.f32 %v692_v23, %v686_v22  ;;  %v782_v43 = vmul.f32 %v2140_v45, %v1745_v40  ;;  %v2384_v61 = vstv %s2325_s12  ;;  %v2389_v53 = vadd.f32 %v2091_v6, %v717_v31  ;;  %p1402_p13 = pneg %p1401_p6 }
  0xdb   : > { %v838_v5 = vmul.f32 %v2256_v35, %v2800_v10  ;;  %v2392_v63 = vstv %s2331_s9  ;;  %v2395_v29 = vstv %s2336_s29  ;;  %v2398_v60 = vadd.f32 %v2275_v26, %v605_v41 }
  0xdc   : > { %v2354_v17 = vpop.permute.xlu1 %550  ;;  %v2400_v16 = vadd.f32 %v691_v14, %v685_v12  ;;  %v2403_v51 = vstv %s2338_s13  ;;  %v988_v36 = vadd.f32 %v984_v54, %v978_v28  ;;  %v706_v23 = vadd.f32 %v702_v44, %v696_v7  ;;  %p1407_p8 = pnand %p1406_p7, %p1402_p13 }
  0xdd   : > { %2795 = vst [vmem:[#allocation34_spill] sm:$0xff] %v2354_v17  ;;  %v772_v17 = vmul.f32 %v2799_v37, %v2794_v4  ;;  %v712_v62 = vmul.f32 %v2791_v47, %v1788_v57  ;;  %v2408_v10 = vstv %s2352_s11  ;;  %v792_v26 = vmul.f32 %v2161_v0, %v1780_v55 }
  0xde   : > { %v852_v14 = vmul.f32 %v2392_v63, %v2793_v34  ;;  %v862_v41 = vmul.f32 %v2395_v29, %v2794_v4  ;;  %v2418_v31 = vadd.f32 %v838_v5, %v752_v20  ;;  %v2421_v47 = vmul.f32 %v2314_v58, %v817_v13 }
  0xdf   : > { %v776_v35 = vadd.f32 %v772_v17, %v766_v50  ;;  %v846_v50 = vmul.f32 %v2384_v61, %v2792_v46  ;;  %v727_v12 = vmax.f32 %v2389_v53, 0.0  ;;  %v2425_v28 = vadd.f32 %v2254_v18, %v570_v1 }
  0xe0   : > { %v2379_v38 = vpop.permute.xlu2 %730  ;;  %v994_v54 = vadd.f32 %v2403_v51, %v988_v36  ;;  %v872_v44 = vmul.f32 %v2408_v10, %v1745_v40  ;;  %v848_v7 = vmul.f32 %v2384_v61, %v2785_v11  ;;  %v716_v20 = vadd.f32 %v712_v62, %v706_v23 }
  0xe1   : > { %2801 = vst [vmem:[#allocation28_spill] sm:$0xff] %v2379_v38  ;;  %v786_v17 = vadd.f32 %v782_v43, %v776_v35  ;;  %v856_v22 = vadd.f32 %v852_v14, %v846_v50  ;;  %v2433_v5 = vstv %s2376_s14  ;;  %v854_v58 = vmul.f32 %v2392_v63, %v2786_v25  ;;  %v2804_v38 = vld [vmem:[#allocation39_spill] sm:$0xff] }
  0xe2   : > { %v864_v13 = vmul.f32 %v2395_v29, %v2788_v2  ;;  %v802_v1 = vmul.f32 %v2178_v56, %v1788_v57  ;;  %v2442_v43 = vstv %s2386_s16  ;;  %v2444_v35 = vstv %s1206_s18 }
  0xe3   : > { %v796_v18 = vadd.f32 %v792_v26, %v786_v17  ;;  %v866_v53 = vadd.f32 %v862_v41, %v856_v22  ;;  %v858_v36 = vadd.f32 %v854_v58, %v848_v7  ;;  %v874_v11 = vmul.f32 %v2408_v10, %v2790_v48  ;;  %v2463_v58 = vpop.permute.xlu0 %640 }
  0xe4   : > { %v936_v23 = vmul.f32 %v2286_v27, %v2792_v46  ;;  %v882_v2 = vmul.f32 %v2433_v5, %v1780_v55  ;;  %v942_v50 = vmul.f32 %v2289_v21, %v2793_v34  ;;  %v952_v17 = vmul.f32 %v2296_v9, %v2794_v4 }
  0xe5   : > { %v739_v49 = vpop.permute.xlu1 %738  ;;  %v876_v62 = vadd.f32 %v872_v44, %v866_v53  ;;  %v998_v26 = vmax.f32 %v994_v54, 0.0  ;;  %v722_v14 = vadd.f32 %v2091_v6, %v716_v20  ;;  %v868_v41 = vadd.f32 %v864_v13, %v858_v36 }
  0xe6   : > { %v884_v48 = vmul.f32 %v2433_v5, %v1724_v32  ;;  %v806_v22 = vadd.f32 %v802_v1, %v796_v18  ;;  %v892_v46 = vmul.f32 %v2442_v43, %v1788_v57  ;;  %v946_v44 = vadd.f32 %v942_v50, %v936_v23 }
  0xe7   : > { %v962_v7 = vmul.f32 %v2306_v24, %v1745_v40  ;;  %v878_v53 = vadd.f32 %v874_v11, %v868_v41  ;;  %v894_v4 = vmul.f32 %v2442_v43, %v1751_v42  ;;  %v847_v54 = vmul.f32 %v2384_v61, %v2755_v59 }
  0xe8   : > { %v853_v32 = vmul.f32 %v2392_v63, %v2756_v39  ;;  %v886_v20 = vadd.f32 %v882_v2, %v876_v62  ;;  %v956_v13 = vadd.f32 %v952_v17, %v946_v44  ;;  %v972_v18 = vmul.f32 %v2321_v33, %v1780_v55  ;;  %v2802_v62 = vld [vmem:[#allocation35_spill] sm:$0xff] }
  0xe9   : > { %v1013_v25 = vpop.permute.xlu2 %1012  ;;  %v863_v40 = vmul.f32 %v2395_v29, %v2757_v15  ;;  %v726_v1 = vmax.f32 %v722_v14, 0.0  ;;  %v888_v36 = vadd.f32 %v884_v48, %v878_v53  ;;  %v873_v42 = vmul.f32 %v2408_v10, %v1805_v3 }
  0xea   : > { %v857_v11 = vadd.f32 %v853_v32, %v847_v54  ;;  %v812_v23 = vadd.f32 %v2215_v19, %v806_v22  ;;  %v966_v50 = vadd.f32 %v962_v7, %v956_v13  ;;  %v982_v41 = vmul.f32 %v2348_v8, %v1788_v57  ;;  %v2803_v54 = vld [vmem:[#allocation38_spill] sm:$0xff] }
  0xeb   : > { %v883_v2 = vmul.f32 %v2433_v5, %v2802_v62  ;;  %v898_v17 = vadd.f32 %v894_v4, %v888_v36  ;;  %v937_v44 = vmul.f32 %v2286_v27, %v2755_v59  ;;  %v943_v14 = vmul.f32 %v2289_v21, %v2756_v39 }
  0xec   : > { %v867_v55 = vadd.f32 %v863_v40, %v857_v11  ;;  %v896_v48 = vadd.f32 %v892_v46, %v886_v20  ;;  %v976_v53 = vadd.f32 %v972_v18, %v966_v50  ;;  %v893_v22 = vmul.f32 %v2442_v43, %v2803_v54  ;;  %v825_v46 = vpop.permute.xlu0 %824 }
  0xed   : > { %v735_v34 = vpop.permute.xlu1 %734  ;;  %v953_v7 = vmul.f32 %v2296_v9, %v2757_v15  ;;  %v904_v57 = vadd.f32 %v2444_v35, %v898_v17  ;;  %v947_v13 = vadd.f32 %v943_v14, %v937_v44  ;;  %v963_v4 = vmul.f32 %v2306_v24, %v1805_v3  ;;  %v2805_v3 = vld [vmem:[#allocation40_spill] sm:$0xff] }
  0xee   : > { %v877_v32 = vadd.f32 %v873_v42, %v867_v55  ;;  %v747_v40 = vmul.f32 %v739_v49, %v727_v12  ;;  %v1018_v59 = vmul.f32 %v1013_v25, %v998_v26  ;;  %v986_v11 = vadd.f32 %v982_v41, %v976_v53 }
  0xef   : > { %v973_v39 = vmul.f32 %v2321_v33, %v2802_v62  ;;  %v908_v20 = vmax.f32 %v904_v57, 0.0  ;;  %v957_v50 = vadd.f32 %v953_v7, %v947_v13  ;;  %v755_v15 = vmul.f32 %v2796_v30, %v2804_v38  ;;  %v2806_v62 = vld [vmem:[#allocation33_spill] sm:$0xff] }
  0xf0   : > { %v887_v18 = vadd.f32 %v883_v2, %v877_v32  ;;  %v746_v17 = vmul.f32 %v735_v34, %v726_v1  ;;  %v816_v42 = vmax.f32 %v812_v23, 0.0  ;;  %v902_v55 = vadd.f32 %v2444_v35, %v896_v48  ;;  %v2807_v30 = vld [vmem:[#allocation41_spill] sm:$0xff] }
  0xf1   : > { %v761_v49 = vmul.f32 %v2798_v52, %v2805_v3  ;;  %v967_v26 = vadd.f32 %v963_v4, %v957_v50  ;;  %v983_v41 = vmul.f32 %v2348_v8, %v2803_v54  ;;  %v751_v2 = vadd.f32 %v747_v40, %v2806_v62 }
  0xf2   : > { %v915_v36 = vpop.permute.xlu2 %914  ;;  %v897_v25 = vadd.f32 %v893_v22, %v887_v18  ;;  %v992_v14 = vadd.f32 %v2403_v51, %v986_v11  ;;  %v771_v34 = vmul.f32 %v2799_v37, %v2807_v30  ;;  %v845_v52 = vmul.f32 %v2384_v61, %v2804_v38  ;;  %v2808_v11 = vld [vmem:[#allocation42_spill] sm:$0xff] }
  0xf3   : > { %v765_v53 = vadd.f32 %v761_v49, %v755_v15  ;;  %v977_v48 = vadd.f32 %v973_v39, %v967_v26  ;;  %v750_v22 = vadd.f32 %v746_v17, %v2425_v28  ;;  %v836_v7 = vmul.f32 %v825_v46, %v816_v42  ;;  %v2809_v49 = vld [vmem:[#allocation19_spill] sm:$0xff] }
  0xf4   : > { %v903_v23 = vadd.f32 %v2444_v35, %v897_v25  ;;  %v851_v54 = vmul.f32 %v2392_v63, %v2805_v3  ;;  %v861_v57 = vmul.f32 %v2395_v29, %v2807_v30  ;;  %v906_v32 = vmax.f32 %v902_v55, 0.0  ;;  %v1009_v28 = vpop.permute.xlu0 %1008  ;;  %v2812_v25 = vld [vmem:[#allocation46_spill] sm:$0xff] }
  0xf5   : > { %v987_v4 = vadd.f32 %v983_v41, %v977_v48  ;;  %v775_v40 = vadd.f32 %v771_v34, %v765_v53  ;;  %v781_v39 = vmul.f32 %v2140_v45, %v2808_v11  ;;  %v935_v63 = vmul.f32 %v2286_v27, %v2804_v38  ;;  %v2811_v38 = vld [vmem:[#allocation15_spill] sm:$0xff]  ;;  %v2813_v41 = vld [vmem:[#allocation16_spill] sm:$0xff] }
  0xf6   : > { %v923_v44 = vpop.permute.xlu1 %922  ;;  %v907_v37 = vmax.f32 %v903_v23, 0.0  ;;  %v855_v61 = vadd.f32 %v851_v54, %v845_v52  ;;  %v941_v29 = vmul.f32 %v2289_v21, %v2805_v3  ;;  %v871_v15 = vmul.f32 %v2408_v10, %v2808_v11  ;;  %v2815_v48 = vld [vmem:[#allocation31_spill] sm:$0xff] }
  0xf7   : > { %v928_v12 = vmul.f32 %v923_v44, %v908_v20  ;;  %v996_v20 = vmax.f32 %v992_v14, 0.0  ;;  %v993_v46 = vadd.f32 %v2403_v51, %v987_v4  ;;  %v951_v45 = vmul.f32 %v2296_v9, %v2807_v30  ;;  %v2817_v54 = vld [vmem:[#allocation55_spill] sm:$0xff] }
  0xf8   : > { %v926_v17 = vmul.f32 %v915_v36, %v906_v32  ;;  %v945_v44 = vadd.f32 %v941_v29, %v935_v63  ;;  %v625_v21 = vadd.f32 %v2811_v38, %v2398_v60  ;;  %v785_v3 = vadd.f32 %v781_v39, %v775_v40  ;;  %v2818_v32 = vld [vmem:[#allocation23_spill] sm:$0xff]  ;;  %v2821_v63 = vld [vmem:[#allocation34_spill] sm:$0xff] }
  0xf9   : > { %v932_v1 = vadd.f32 %v928_v12, %v2418_v31  ;;  %v841_v31 = vadd.f32 %v2421_v47, %v751_v2  ;;  %v865_v47 = vadd.f32 %v861_v57, %v855_v61  ;;  %v997_v55 = vmax.f32 %v993_v46, 0.0  ;;  %v2810_v12 = vld [vmem:[#allocation36_spill] sm:$0xff] }
  0xfa   : > { %v541_v27 = vadd.f32 %v2810_v12, %v2809_v49  ;;  %v791_v26 = vmul.f32 %v2161_v0, %v2812_v25  ;;  %v705_v10 = vadd.f32 %v2813_v41, %v2400_v16  ;;  %v881_v14 = vmul.f32 %v2433_v5, %v2812_v25  ;;  %v2822_v49 = vld [vmem:[#allocation28_spill] sm:$0xff] }
  0xfb   : > { %v1022_v13 = vadd.f32 %v1018_v59, %v932_v1  ;;  %v840_v59 = vadd.f32 %v836_v7, %v750_v22  ;;  %v1005_v18 = vpop.permute.xlu2 %1004  ;;  %v1017_v9 = vmul.f32 %v1009_v28, %v997_v55  ;;  %v875_v36 = vadd.f32 %v871_v15, %v865_v47  ;;  %v2814_v1 = vld [vmem:[#allocation54_spill] sm:$0xff]  ;;  %v2816_v22 = vld [vmem:[#allocation48_spill] sm:$0xff] }
  0xfc   : > { %v1016_v62 = vmul.f32 %v1005_v18, %v996_v20  ;;  %v955_v53 = vadd.f32 %v951_v45, %v945_v44  ;;  %v961_v30 = vmul.f32 %v2306_v24, %v2808_v11  ;;  %v455_v23 = vmax.f32 %v2814_v1, 0.0  ;;  %v2819_v11 = vld [vmem:[#allocation59_spill] sm:$0xff] }
  0xfd   : > { %1041 = vmatpush.msra.mxu0 %v1022_v13  ;;  %v930_v34 = vadd.f32 %v926_v17, %v840_v59  ;;  %v361_v0 = vmax.f32 %v2815_v48, 0.0  ;;  %v795_v52 = vadd.f32 %v791_v26, %v785_v3  ;;  %v801_v16 = vmul.f32 %v2178_v56, %v2816_v22  ;;  %v2820_v56 = vld [vmem:[#allocation27_spill] sm:$0xff] }
  0xfe   : > { %v919_v50 = vpop.permute.xlu1 %918  ;;  %v545_v7 = vmax.f32 %v541_v27, 0.0  ;;  %v631_v57 = vadd.f32 %v2817_v54, %v625_v21  ;;  %v715_v13 = vadd.f32 %v2818_v32, %v705_v10  ;;  %v891_v24 = vmul.f32 %v2442_v43, %v2816_v22 }
  0xff   : > { %v927_v42 = vmul.f32 %v919_v50, %v907_v37  ;;  %v1020_v5 = vadd.f32 %v1016_v62, %v930_v34  ;;  %v885_v37 = vadd.f32 %v881_v14, %v875_v36  ;;  %v965_v4 = vadd.f32 %v961_v30, %v955_v53 }
 0x100   : > { %v475_v39 = vmul.f32 %v2819_v11, %v455_v23  ;;  %v385_v61 = vmul.f32 %v2820_v56, %v361_v0  ;;  %v805_v20 = vadd.f32 %v801_v16, %v795_v52  ;;  %v635_v28 = vmax.f32 %v631_v57, 0.0 }
 0x101   : > { %v931_v2 = vadd.f32 %v927_v42, %v841_v31  ;;  %v971_v31 = vmul.f32 %v2321_v33, %v2812_v25  ;;  %v721_v46 = vadd.f32 %v2091_v6, %v715_v13  ;;  %v565_v29 = vmul.f32 %v2821_v63, %v545_v7 }
 0x102   : > { %v895_v59 = vadd.f32 %v891_v24, %v885_v37  ;;  %v981_v43 = vmul.f32 %v2348_v8, %v2816_v22  ;;  %v479_v50 = vadd.f32 %v475_v39, %v385_v61  ;;  %v811_v33 = vadd.f32 %v2215_v19, %v805_v20 }
 0x103   : > { %v1021_v60 = vadd.f32 %v1017_v9, %v931_v2  ;;  %v975_v18 = vadd.f32 %v971_v31, %v965_v4  ;;  %v655_v47 = vmul.f32 %v2463_v58, %v635_v28  ;;  %v725_v45 = vmax.f32 %v721_v46, 0.0 }
 0x104   : > { %v569_v15 = vadd.f32 %v565_v29, %v479_v50  ;;  %v901_v17 = vadd.f32 %v2444_v35, %v895_v59  ;;  %v815_v55 = vmax.f32 %v811_v33, 0.0  ;;  %v1472_v10 = vmov 1.0  }
 0x105   : > { %1042 = vmatpush.msra.mxu0 %v1021_v60  ;;  %v985_v42 = vadd.f32 %v981_v43, %v975_v18  ;;  %v745_v12 = vmul.f32 %v2822_v49, %v725_v45 }
 0x106   : > { %v659_v6 = vadd.f32 %v655_v47, %v569_v15  ;;  %v905_v27 = vmax.f32 %v901_v17, 0.0 }
 0x107   : > { %v821_v40 = vpop.permute.xlu1 %820  ;;  %1043 = vmatpush.msra.mxu0 %v1020_v5  ;;  %v991_v38 = vadd.f32 %v2403_v51, %v985_v42  ;;  %v1024_v51 = vstv %s1023_s24 }
 0x108   : > { %v835_v8 = vmul.f32 %v821_v40, %v815_v55  ;;  %v749_v21 = vadd.f32 %v745_v12, %v659_v6 }
 0x109   : > { %v995_v3 = vmax.f32 %v991_v38, 0.0 }
 0x10a   : > { %v839_v58 = vadd.f32 %v835_v8, %v749_v21 }
 0x110   : > { %v911_v44 = vpop.permute.xlu1 %910 }
 0x111   : > { %v925_v19 = vmul.f32 %v911_v44, %v905_v27 }
 0x113   : > { %v929_v26 = vadd.f32 %v925_v19, %v839_v58 }
 0x119   : > { %v1001_v25 = vpop.permute.xlu1 %1000 }
 0x11a   : > { %v1015_v41 = vmul.f32 %v1001_v25, %v995_v3 }
 0x11c   : > { %v1019_v35 = vadd.f32 %v1015_v41, %v929_v26 }
 0x11e   : > { %1044 = vmatpush.msra.mxu0 %v1019_v35 }
 0x11f   : > { %1214 = vmatmul.msk.f32.vlgmr.msra.gmra.mxu0 %vm1025_vm0, %v1472_v10 }
 0x19c   : > { %v1046_v62 = vpop.f32.mrf.mxu0 }
 0x19d   : > { %v1047_v2 = vadd.f32 %v1046_v62, %v1024_v51 }
 0x19f   : > { %1049 = vst [vmem:[%s270_s2] sm:$0x1] %v1047_v2 }
 0x1a0   : > { %1410 = shalt.err (!%p1407_p8)
}
 0x1a1   : > { %1229 = dma.vmem_to_hbm [thread:$0]  (%p1558_p11), %s1062_s3, 16, %s1064_s8, %s1051_s15  }
 0x1a2 PF: > { %p1251_p9 = scmp.ge.s32.totalorder %s1457_s23, 2  ;;  %s1075_s27 = sand.u32 1, %s1445_s20  }
 0x1a3   : > { %s1076_s11 = scalar_lea.sflag [#allocation5], %s1075_s27 }
 0x1a4   : > { %p1243_p10 = pnand %p1251_p9, %p1562_p12 }
 0x1a6   : > { %p1244_p1 = pneg %p1243_p10 }
 0x1a8   : > { %1440 = dma.done.wait (%p1244_p1), %s1076_s11, 16  }
 0x1a9   : > { %1442 = vsyncadd (%p1244_p1), %s1076_s11, 4294967280  ;;  %p21_p0 = scmp.ge.s32.totalorder %s1531_s25, 6   ;;  %s2823_s20 = smov %s1449_s21 }
 0x1aa   : > { %s2824_s21 = smov %s1453_s22  ;;  %s2825_s22 = smov %s1543_s28 }
 0x1ab   : > { %s2826_s23 = smov %s1531_s25  ;;  %23 = sbr.rel (!%p21_p0) target bundleno = 11 (0xb), region = 94 }
 0x1b0   :  { %1081 = vsyncpa [#allocation4], 1 }
 0x1b1   :  { %1083 = vsyncpa [#allocation4 + $0x1], 1 }
 0x1b2   :  { %1084 = vsyncpa [#allocation5], 1 }
 0x1b3   :  { %1086 = vsyncpa [#allocation5 + $0x1], 1 }
 0x1b4   :  { %1087 = vsyncpa [#allocation6], 1 }
 0x1b5   :  { %1089 = vsyncpa [#allocation6 + $0x1], 1 }
 0x1b6   :  { %1090 = vsyncpa [#allocation9], 1 }

</bundles_post_ra>
